<compile_context>
chip_gen: v7x
topology: tpu7x:2x2x1
jax: 0.10.0
libtpu: 0.0.40
codegen_flags: <defaults>
</compile_context>

<pallas_src>
import jax
import jax.numpy as jnp
from jax.experimental import pallas as pl
from jax.experimental.pallas import tpu as pltpu


_VMEM_LIMIT = 48 * 1024 * 1024  # raised scoped-VMEM limit (v5e default is 16 MiB)


# ----------------------------------------------------------------------------
# Pallas kernels
# ----------------------------------------------------------------------------
def _conv_gemm_kernel(col_ref, w_ref, b_ref, o_ref):
    # col block: (1, K, tm) bf16 ; w: (Cout, K) bf16 ; b: (Cout, 1) f32
    acc = jnp.dot(w_ref[...], col_ref[0], preferred_element_type=jnp.float32)
    acc = jnp.maximum(acc + b_ref[...], 0.0)          # bias + ReLU in f32
    o_ref[0] = acc.astype(o_ref.dtype)                # (Cout, tm) lane-dense


def _conv_pool_gemm_kernel(col_ref, w_ref, b_ref, o_ref):
    # col block: (1, 4, K, ts); the 4 planes are the 2x2 pool parities.
    w = w_ref[...]
    g0 = jnp.dot(w, col_ref[0, 0], preferred_element_type=jnp.float32)
    g1 = jnp.dot(w, col_ref[0, 1], preferred_element_type=jnp.float32)
    g2 = jnp.dot(w, col_ref[0, 2], preferred_element_type=jnp.float32)
    g3 = jnp.dot(w, col_ref[0, 3], preferred_element_type=jnp.float32)
    m = jnp.maximum(jnp.maximum(g0, g1), jnp.maximum(g2, g3))   # fused max-pool
    o_ref[0] = jnp.maximum(m + b_ref[...], 0.0).astype(o_ref.dtype)


def _fc_head_kernel(x_ref, w1_ref, b1_ref, w2_ref, b2_ref, w3_ref, b3_ref,
                    o_ref, acc_ref):
    k = pl.program_id(0)

    @pl.when(k == 0)
    def _():
        acc_ref[...] = jnp.zeros_like(acc_ref)

    # K-tiled fc1 accumulation (f32 accumulator in VMEM).
    acc_ref[...] += jnp.dot(x_ref[...], w1_ref[...],
                            preferred_element_type=jnp.float32)

    @pl.when(k == pl.num_programs(0) - 1)
    def _():
        h1 = jnp.maximum(acc_ref[...] + b1_ref[...], 0.0)
        # Dropout(p=0.2): identity at inference.
        h2 = jnp.dot(h1.astype(w2_ref.dtype), w2_ref[...],
                     preferred_element_type=jnp.float32) + b2_ref[...]
        h2 = jnp.maximum(h2, 0.0)
        # Dropout(p=0.2): identity at inference.
        o = jnp.dot(h2.astype(w3_ref.dtype), w3_ref[...],
                    preferred_element_type=jnp.float32) + b3_ref[...]
        o_ref[...] = o.astype(o_ref.dtype)


# ----------------------------------------------------------------------------
# Tiling helpers & im2col wrappers
# ----------------------------------------------------------------------------
def _round_up(x, m):
    return ((x + m - 1) // m) * m


def _plan_lane_tiling(m, cap=2048):
    """Return (tile, padded_m): tile is a multiple of 128 dividing padded_m.

    Prefers larger tiles (fewer grid steps, denser MXU feeds) as long as the
    zero-pad waste stays small (<= max(128, m/8) extra lanes)."""
    best_tile, best_mp = 128, _round_up(m, 128)
    for align in (256, 512, 1024, 2048):
        if align > cap:
            break
        mp = _round_up(m, align)
        if mp - m <= max(128, m // 8):
            best_tile, best_mp = align, mp
    # Take any larger exact divisor of the chosen padded extent.
    t = best_tile
    while t + 128 <= min(cap, best_mp):
        t += 128
        if best_mp % t == 0:
            best_tile = t
    return best_tile, best_mp


def _im2col_T(x, w_shape, stride, padding):
    """x: [N,Cin,D,H,W] -> patches [N, K, Do*Ho*Wo] with K = Cin*kd*kh*kw."""
    N, C, D, H, W = x.shape
    _, _, kd, kh, kw = w_shape
    sd, sh, sw = stride
    pd, ph, pw = padding
    xp = jnp.pad(x, ((0, 0), (0, 0), (pd, pd), (ph, ph), (pw, pw)))
    Do = (D + 2 * pd - kd) // sd + 1
    Ho = (H + 2 * ph - kh) // sh + 1
    Wo = (W + 2 * pw - kw) // sw + 1
    taps = []
    for i in range(kd):
        for j in range(kh):
            for k in range(kw):
                taps.append(xp[:, :, i:i + sd * Do:sd,
                               j:j + sh * Ho:sh, k:k + sw * Wo:sw])
    col = jnp.stack(taps, axis=2)                     # [N, C, kvol, Do, Ho, Wo]
    return col.reshape(N, C * kd * kh * kw, Do * Ho * Wo), (Do, Ho, Wo)


def _im2col_T_pooled(x):
    """im2col for Conv3d(k=3, stride=(1,2,2), pad=1) with output positions
    enumerated as (2x2 pool parity, do, hp, wp) so the (1,2,2) max-pool becomes
    an elementwise max over 4 planes inside the GEMM kernel.
    x: [N,C,D,H,W] -> [N, 4, K, Do*Hp*Wp]."""
    N, C, D, H, W = x.shape
    xp = jnp.pad(x, ((0, 0), (0, 0), (1, 1), (1, 1), (1, 1)))
    Do = D
    Ho = (H - 1) // 2 + 1
    Wo = (W - 1) // 2 + 1
    Hp, Wp = Ho // 2, Wo // 2                         # floor, matches MaxPool3d
    planes = []
    for ph in range(2):
        for pw in range(2):
            taps = []
            for i in range(3):
                for j in range(3):
                    for k in range(3):
                        a = 2 * ph + j
                        b = 2 * pw + k
                        taps.append(xp[:, :, i:i + Do,
                                       a:a + 4 * Hp:4, b:b + 4 * Wp:4])
            t = jnp.stack(taps, axis=2)               # [N, C, 27, Do, Hp, Wp]
            planes.append(t.reshape(N, C * 27, Do * Hp * Wp))
    return jnp.stack(planes, axis=1), (Do, Hp, Wp)    # [N, 4, K, S]


# ----------------------------------------------------------------------------
# Pallas-call wrappers
# ----------------------------------------------------------------------------
def conv3d_relu_pallas(x, w, b):
    """Conv3d(k=3, stride=(1,2,2), pad=1) + ReLU, NCDHW in -> NCDHW bf16 out."""
    x = x.astype(jnp.bfloat16)
    N = x.shape[0]
    Cout = w.shape[0]
    col, (Do, Ho, Wo) = _im2col_T(x, w.shape, (1, 2, 2), (1, 1, 1))
    K, M = col.shape[1], col.shape[2]
    tm, Mp = _plan_lane_tiling(M)
    if Mp != M:
        col = jnp.pad(col, ((0, 0), (0, 0), (0, Mp - M)))
    wmat = w.reshape(Cout, K).astype(jnp.bfloat16)
    bias = b.reshape(Cout, 1).astype(jnp.float32)
    out = pl.pallas_call(
        _conv_gemm_kernel,
        out_shape=jax.ShapeDtypeStruct((N, Cout, Mp), jnp.bfloat16),
        grid_spec=pltpu.PrefetchScalarGridSpec(
            num_scalar_prefetch=0,
            grid=(N, Mp // tm),
            in_specs=[
                pl.BlockSpec((1, K, tm), lambda n, m: (n, 0, m)),
                pl.BlockSpec((Cout, K), lambda n, m: (0, 0)),
                pl.BlockSpec((Cout, 1), lambda n, m: (0, 0)),
            ],
            out_specs=pl.BlockSpec((1, Cout, tm), lambda n, m: (n, 0, m)),
        ),
        compiler_params=pltpu.CompilerParams(
            dimension_semantics=("parallel", "parallel"),
            vmem_limit_bytes=_VMEM_LIMIT),
    )(col, wmat, bias)
    return out[:, :, :M].reshape(N, Cout, Do, Ho, Wo)


def conv3d_relu_maxpool_pallas(x, w, b):
    """Conv3d(k=3, stride=(1,2,2), pad=1) + ReLU + MaxPool3d(1,2,2), fused."""
    x = x.astype(jnp.bfloat16)
    N = x.shape[0]
    Cout = w.shape[0]
    col, (Do, Hp, Wp) = _im2col_T_pooled(x)
    K, S = col.shape[2], col.shape[3]
    ts, Sp = _plan_lane_tiling(S)
    if Sp != S:
        col = jnp.pad(col, ((0, 0), (0, 0), (0, 0), (0, Sp - S)))
    wmat = w.reshape(Cout, K).astype(jnp.bfloat16)
    bias = b.reshape(Cout, 1).astype(jnp.float32)
    out = pl.pallas_call(
        _conv_pool_gemm_kernel,
        out_shape=jax.ShapeDtypeStruct((N, Cout, Sp), jnp.bfloat16),
        grid_spec=pltpu.PrefetchScalarGridSpec(
            num_scalar_prefetch=0,
            grid=(N, Sp // ts),
            in_specs=[
                pl.BlockSpec((1, 4, K, ts), lambda n, s: (n, 0, 0, s)),
                pl.BlockSpec((Cout, K), lambda n, s: (0, 0)),
                pl.BlockSpec((Cout, 1), lambda n, s: (0, 0)),
            ],
            out_specs=pl.BlockSpec((1, Cout, ts), lambda n, s: (n, 0, s)),
        ),
        compiler_params=pltpu.CompilerParams(
            dimension_semantics=("parallel", "parallel"),
            vmem_limit_bytes=_VMEM_LIMIT),
    )(col, wmat, bias)
    return out[:, :, :S].reshape(N, Cout, Do, Hp, Wp)


def fc_head_pallas(x, w1, b1, w2, b2, w3, b3, *, tk=512):
    """fc1+ReLU -> fc2+ReLU -> fc3, all in one pallas_call (fc1 K-tiled)."""
    B, F = x.shape
    H1, H2, H3 = w1.shape[1], w2.shape[1], w3.shape[1]
    Bp = _round_up(B, 8)                              # pad rows to a sublane multiple
    tk = min(tk, F)
    Fp = _round_up(F, tk)
    xp = jnp.pad(x.astype(jnp.bfloat16), ((0, Bp - B), (0, Fp - F)))
    w1p = jnp.pad(w1.astype(jnp.bfloat16), ((0, Fp - F), (0, 0)))
    out = pl.pallas_call(
        _fc_head_kernel,
        out_shape=jax.ShapeDtypeStruct((Bp, H3), jnp.float32),
        grid_spec=pltpu.PrefetchScalarGridSpec(
            num_scalar_prefetch=0,
            grid=(Fp // tk,),
            in_specs=[
                pl.BlockSpec((Bp, tk), lambda k: (0, k)),
                pl.BlockSpec((tk, H1), lambda k: (k, 0)),
                pl.BlockSpec((1, H1), lambda k: (0, 0)),
                pl.BlockSpec((H1, H2), lambda k: (0, 0)),
                pl.BlockSpec((1, H2), lambda k: (0, 0)),
                pl.BlockSpec((H2, H3), lambda k: (0, 0)),
                pl.BlockSpec((1, H3), lambda k: (0, 0)),
            ],
            out_specs=pl.BlockSpec((Bp, H3), lambda k: (0, 0)),
            scratch_shapes=[pltpu.VMEM((Bp, H1), jnp.float32)],
        ),
        compiler_params=pltpu.CompilerParams(
            dimension_semantics=("arbitrary",),
            vmem_limit_bytes=_VMEM_LIMIT),
    )(xp, w1p,
      b1.reshape(1, H1).astype(jnp.float32),
      w2.astype(jnp.bfloat16), b2.reshape(1, H2).astype(jnp.float32),
      w3.astype(jnp.bfloat16), b3.reshape(1, H3).astype(jnp.float32))
    return out[:B, 0]                                  # .squeeze(-1)


# ----------------------------------------------------------------------------
# Model: parameters + forward
# ----------------------------------------------------------------------------
def init_params(key, image_size):
    H, W = image_size

    def conv_out(s):
        return (s + 2 * 1 - 3) // 2 + 1

    H1, W1 = conv_out(H), conv_out(W)
    H2, W2 = conv_out(H1), conv_out(W1)
    Hp, Wp = H2 // 2, W2 // 2
    flattened = 32 * 3 * Hp * Wp                      # C=32, D=3 after both convs

    keys = jax.random.split(key, 10)

    def normal(k, shape, fan_in):
        return jax.random.normal(k, shape, jnp.float32) / jnp.sqrt(fan_in)

    params = {
        "conv1_w": normal(keys[0], (16, 3, 3, 3, 3), 3 * 27),
        "conv1_b": normal(keys[1], (16,), 3 * 27),
        "conv2_w": normal(keys[2], (32, 16, 3, 3, 3), 16 * 27),
        "conv2_b": normal(keys[3], (32,), 16 * 27),
        "fc1_w": normal(keys[4], (flattened, 256), flattened),
        "fc1_b": normal(keys[5], (256,), flattened),
        "fc2_w": normal(keys[6], (256, 64), 256),
        "fc2_b": normal(keys[7], (64,), 256),
        "fc3_w": normal(keys[8], (64, 1), 64),
        "fc3_b": normal(keys[9], (1,), 64),
    }
    return params, flattened


def forward(params, x):
    """x: [N, 3, 3, H, W] (NCDHW) -> predicted steering angle [N]."""
    x = conv3d_relu_pallas(x, params["conv1_w"], params["conv1_b"])
    x = conv3d_relu_maxpool_pallas(x, params["conv2_w"], params["conv2_b"])
    n = x.shape[0]
    x = x.reshape(n, -1)                              # NCDHW flatten == PyTorch order
    return fc_head_pallas(x, params["fc1_w"], params["fc1_b"],
                          params["fc2_w"], params["fc2_b"],
                          params["fc3_w"], params["fc3_b"])


if __name__ == "__main__":
    image_size = (32, 32)                             # small spatial size for the demo
    batch = 2
    key = jax.random.PRNGKey(0)
    k_params, k_x = jax.random.split(key)
    params, flattened = init_params(k_params, image_size)
    x = jax.random.normal(k_x, (batch, 3, 3, image_size[0], image_size[1]),
                          jnp.float32)
    out = jax.jit(forward)(params, x)
    out = jax.block_until_ready(out)
    assert out.shape == (batch,), out.shape
    assert bool(jnp.all(jnp.isfinite(out)))
    print("KERNEL_OK")
</pallas_src>

<mosaic_0001>
module attributes {stable_mosaic.version = 11 : i64} {
  func.func @_conv_gemm_kernel(%arg0: i32, %arg1: i32, %arg2: memref<1x81x768xbf16, #tpu.memory_space<vmem>>, %arg3: memref<16x81xbf16, #tpu.memory_space<vmem>>, %arg4: memref<16x1xf32, #tpu.memory_space<vmem>>, %arg5: memref<1x16x768xbf16, #tpu.memory_space<vmem>>) attributes {dimension_semantics = [#tpu.dimension_semantics<parallel>, #tpu.dimension_semantics<parallel>], iteration_bounds = array<i64: 2, 1>, scalar_prefetch = 0 : i64, scratch_operands = 0 : i64, tpu.core_type = #tpu.core_type<tc>, window_params = [{transform_indices = @transform_0, window_bounds = array<i64: 1, 81, 768>}, {pipeline_mode = #tpu.pipeline_mode<synchronous>, transform_indices = @transform_1, window_bounds = array<i64: 16, 81>}, {pipeline_mode = #tpu.pipeline_mode<synchronous>, transform_indices = @transform_2, window_bounds = array<i64: 16, 1>}, {transform_indices = @transform_3, window_bounds = array<i64: 1, 16, 768>}]} {
    %c0 = arith.constant 0 : index
    %c0_0 = arith.constant 0 : index
    %0 = vector.load %arg3[%c0, %c0_0] : memref<16x81xbf16, #tpu.memory_space<vmem>>, vector<16x81xbf16>
    %c0_1 = arith.constant 0 : index
    %c0_2 = arith.constant 0 : index
    %c0_3 = arith.constant 0 : index
    %1 = vector.load %arg2[%c0_1, %c0_2, %c0_3] : memref<1x81x768xbf16, #tpu.memory_space<vmem>>, vector<1x81x768xbf16>
    %2 = vector.shape_cast %1 : vector<1x81x768xbf16> to vector<81x768xbf16>
    %cst = arith.constant dense<0.000000e+00> : vector<16x768xf32>
    %3 = tpu.matmul %0, %2, %cst {dimension_numbers = #tpu.dot_dimension_numbers<[1], [0], [0], [1], [0, 0, 1, 1], [], []>} : vector<16x81xbf16>, vector<81x768xbf16>, vector<16x768xf32> -> vector<16x768xf32>
    %c0_4 = arith.constant 0 : index
    %c0_5 = arith.constant 0 : index
    %4 = vector.load %arg4[%c0_4, %c0_5] : memref<16x1xf32, #tpu.memory_space<vmem>>, vector<16x1xf32>
    %5 = vector.broadcast %4 : vector<16x1xf32> to vector<16x768xf32>
    %6 = arith.addf %3, %5 : vector<16x768xf32>
    %cst_6 = arith.constant 0.000000e+00 : f32
    %7 = vector.broadcast %cst_6 : f32 to vector<16x768xf32>
    %8 = arith.maximumf %6, %7 : vector<16x768xf32>
    %9 = arith.truncf %8 : vector<16x768xf32> to vector<16x768xbf16>
    %c0_7 = arith.constant 0 : index
    %c0_8 = arith.constant 0 : index
    %c0_9 = arith.constant 0 : index
    %10 = vector.load %arg5[%c0_7, %c0_8, %c0_9] : memref<1x16x768xbf16, #tpu.memory_space<vmem>>, vector<1x16x768xbf16>
    %11 = vector.shape_cast %10 : vector<1x16x768xbf16> to vector<16x768xbf16>
    %12 = vector.shape_cast %9 : vector<16x768xbf16> to vector<1x16x768xbf16>
    tpu.vector_store %arg5[%c0_7, %c0_8, %c0_9], %12 {strides = array<i32>} : memref<1x16x768xbf16, #tpu.memory_space<vmem>>, vector<1x16x768xbf16>,
    return
  }
  func.func @transform_0(%arg0: i32, %arg1: i32) -> (i32, i32, i32) {
    %c0_i32 = arith.constant 0 : i32
    %c0_i32_0 = arith.constant 0 : i32
    return %arg0, %c0_i32, %arg1 : i32, i32, i32
  }
  func.func @transform_1(%arg0: i32, %arg1: i32) -> (i32, i32) {
    %c0_i32 = arith.constant 0 : i32
    %c0_i32_0 = arith.constant 0 : i32
    %c0_i32_1 = arith.constant 0 : i32
    return %c0_i32, %c0_i32_0 : i32, i32
  }
  func.func @transform_2(%arg0: i32, %arg1: i32) -> (i32, i32) {
    %c0_i32 = arith.constant 0 : i32
    %c0_i32_0 = arith.constant 0 : i32
    %c0_i32_1 = arith.constant 0 : i32
    return %c0_i32, %c0_i32_0 : i32, i32
  }
  func.func @transform_3(%arg0: i32, %arg1: i32) -> (i32, i32, i32) {
    %c0_i32 = arith.constant 0 : i32
    %c0_i32_0 = arith.constant 0 : i32
    return %arg0, %c0_i32, %arg1 : i32, i32, i32
  }
}

module attributes {stable_mosaic.version = 11 : i64} {
  func.func @_conv_pool_gemm_kernel(%arg0: i32, %arg1: i32, %arg2: memref<1x4x432x128xbf16, #tpu.memory_space<vmem>>, %arg3: memref<32x432xbf16, #tpu.memory_space<vmem>>, %arg4: memref<32x1xf32, #tpu.memory_space<vmem>>, %arg5: memref<1x32x128xbf16, #tpu.memory_space<vmem>>) attributes {dimension_semantics = [#tpu.dimension_semantics<parallel>, #tpu.dimension_semantics<parallel>], iteration_bounds = array<i64: 2, 1>, scalar_prefetch = 0 : i64, scratch_operands = 0 : i64, tpu.core_type = #tpu.core_type<tc>, window_params = [{transform_indices = @transform_0, window_bounds = array<i64: 1, 4, 432, 128>}, {pipeline_mode = #tpu.pipeline_mode<synchronous>, transform_indices = @transform_1, window_bounds = array<i64: 32, 432>}, {pipeline_mode = #tpu.pipeline_mode<synchronous>, transform_indices = @transform_2, window_bounds = array<i64: 32, 1>}, {transform_indices = @transform_3, window_bounds = array<i64: 1, 32, 128>}]} {
    %c0 = arith.constant 0 : index
    %c0_0 = arith.constant 0 : index
    %0 = vector.load %arg3[%c0, %c0_0] : memref<32x432xbf16, #tpu.memory_space<vmem>>, vector<32x432xbf16>
    %c0_1 = arith.constant 0 : index
    %c0_2 = arith.constant 0 : index
    %c0_3 = arith.constant 0 : index
    %c0_4 = arith.constant 0 : index
    %1 = vector.load %arg2[%c0_1, %c0_2, %c0_3, %c0_4] : memref<1x4x432x128xbf16, #tpu.memory_space<vmem>>, vector<1x1x432x128xbf16>
    %2 = vector.shape_cast %1 : vector<1x1x432x128xbf16> to vector<432x128xbf16>
    %cst = arith.constant dense<0.000000e+00> : vector<32x128xf32>
    %3 = tpu.matmul %0, %2, %cst {dimension_numbers = #tpu.dot_dimension_numbers<[1], [0], [0], [1], [0, 0, 1, 1], [], []>} : vector<32x432xbf16>, vector<432x128xbf16>, vector<32x128xf32> -> vector<32x128xf32>
    %c0_5 = arith.constant 0 : index
    %c1 = arith.constant 1 : index
    %c0_6 = arith.constant 0 : index
    %c0_7 = arith.constant 0 : index
    %4 = vector.load %arg2[%c0_5, %c1, %c0_6, %c0_7] : memref<1x4x432x128xbf16, #tpu.memory_space<vmem>>, vector<1x1x432x128xbf16>
    %5 = vector.shape_cast %4 : vector<1x1x432x128xbf16> to vector<432x128xbf16>
    %cst_8 = arith.constant dense<0.000000e+00> : vector<32x128xf32>
    %6 = tpu.matmul %0, %5, %cst_8 {dimension_numbers = #tpu.dot_dimension_numbers<[1], [0], [0], [1], [0, 0, 1, 1], [], []>} : vector<32x432xbf16>, vector<432x128xbf16>, vector<32x128xf32> -> vector<32x128xf32>
    %c0_9 = arith.constant 0 : index
    %c2 = arith.constant 2 : index
    %c0_10 = arith.constant 0 : index
    %c0_11 = arith.constant 0 : index
    %7 = vector.load %arg2[%c0_9, %c2, %c0_10, %c0_11] : memref<1x4x432x128xbf16, #tpu.memory_space<vmem>>, vector<1x1x432x128xbf16>
    %8 = vector.shape_cast %7 : vector<1x1x432x128xbf16> to vector<432x128xbf16>
    %cst_12 = arith.constant dense<0.000000e+00> : vector<32x128xf32>
    %9 = tpu.matmul %0, %8, %cst_12 {dimension_numbers = #tpu.dot_dimension_numbers<[1], [0], [0], [1], [0, 0, 1, 1], [], []>} : vector<32x432xbf16>, vector<432x128xbf16>, vector<32x128xf32> -> vector<32x128xf32>
    %c0_13 = arith.constant 0 : index
    %c3 = arith.constant 3 : index
    %c0_14 = arith.constant 0 : index
    %c0_15 = arith.constant 0 : index
    %10 = vector.load %arg2[%c0_13, %c3, %c0_14, %c0_15] : memref<1x4x432x128xbf16, #tpu.memory_space<vmem>>, vector<1x1x432x128xbf16>
    %11 = vector.shape_cast %10 : vector<1x1x432x128xbf16> to vector<432x128xbf16>
    %cst_16 = arith.constant dense<0.000000e+00> : vector<32x128xf32>
    %12 = tpu.matmul %0, %11, %cst_16 {dimension_numbers = #tpu.dot_dimension_numbers<[1], [0], [0], [1], [0, 0, 1, 1], [], []>} : vector<32x432xbf16>, vector<432x128xbf16>, vector<32x128xf32> -> vector<32x128xf32>
    %13 = arith.maximumf %3, %6 : vector<32x128xf32>
    %14 = arith.maximumf %9, %12 : vector<32x128xf32>
    %15 = arith.maximumf %13, %14 : vector<32x128xf32>
    %c0_17 = arith.constant 0 : index
    %c0_18 = arith.constant 0 : index
    %16 = vector.load %arg4[%c0_17, %c0_18] : memref<32x1xf32, #tpu.memory_space<vmem>>, vector<32x1xf32>
    %17 = vector.broadcast %16 : vector<32x1xf32> to vector<32x128xf32>
    %18 = arith.addf %15, %17 : vector<32x128xf32>
    %cst_19 = arith.constant 0.000000e+00 : f32
    %19 = vector.broadcast %cst_19 : f32 to vector<32x128xf32>
    %20 = arith.maximumf %18, %19 : vector<32x128xf32>
    %21 = arith.truncf %20 : vector<32x128xf32> to vector<32x128xbf16>
    %c0_20 = arith.constant 0 : index
    %c0_21 = arith.constant 0 : index
    %c0_22 = arith.constant 0 : index
    %22 = vector.load %arg5[%c0_20, %c0_21, %c0_22] : memref<1x32x128xbf16, #tpu.memory_space<vmem>>, vector<1x32x128xbf16>
    %23 = vector.shape_cast %22 : vector<1x32x128xbf16> to vector<32x128xbf16>
    %24 = vector.shape_cast %21 : vector<32x128xbf16> to vector<1x32x128xbf16>
    tpu.vector_store %arg5[%c0_20, %c0_21, %c0_22], %24 {strides = array<i32>} : memref<1x32x128xbf16, #tpu.memory_space<vmem>>, vector<1x32x128xbf16>,
    return
  }
  func.func @transform_0(%arg0: i32, %arg1: i32) -> (i32, i32, i32, i32) {
    %c0_i32 = arith.constant 0 : i32
    %c0_i32_0 = arith.constant 0 : i32
    %c0_i32_1 = arith.constant 0 : i32
    return %arg0, %c0_i32, %c0_i32_0, %arg1 : i32, i32, i32, i32
  }
  func.func @transform_1(%arg0: i32, %arg1: i32) -> (i32, i32) {
    %c0_i32 = arith.constant 0 : i32
    %c0_i32_0 = arith.constant 0 : i32
    %c0_i32_1 = arith.constant 0 : i32
    return %c0_i32, %c0_i32_0 : i32, i32
  }
  func.func @transform_2(%arg0: i32, %arg1: i32) -> (i32, i32) {
    %c0_i32 = arith.constant 0 : i32
    %c0_i32_0 = arith.constant 0 : i32
    %c0_i32_1 = arith.constant 0 : i32
    return %c0_i32, %c0_i32_0 : i32, i32
  }
  func.func @transform_3(%arg0: i32, %arg1: i32) -> (i32, i32, i32) {
    %c0_i32 = arith.constant 0 : i32
    %c0_i32_0 = arith.constant 0 : i32
    return %arg0, %c0_i32, %arg1 : i32, i32, i32
  }
}

module attributes {stable_mosaic.version = 11 : i64} {
  func.func @_fc_head_kernel(%arg0: i32, %arg1: memref<8x512xbf16, #tpu.memory_space<vmem>>, %arg2: memref<512x256xbf16, #tpu.memory_space<vmem>>, %arg3: memref<1x256xf32, #tpu.memory_space<vmem>>, %arg4: memref<256x64xbf16, #tpu.memory_space<vmem>>, %arg5: memref<1x64xf32, #tpu.memory_space<vmem>>, %arg6: memref<64x1xbf16, #tpu.memory_space<vmem>>, %arg7: memref<1x1xf32, #tpu.memory_space<vmem>>, %arg8: memref<8x1xf32, #tpu.memory_space<vmem>>, %arg9: memref<8x256xf32, #tpu.memory_space<vmem>>) attributes {dimension_semantics = [#tpu.dimension_semantics<arbitrary>], iteration_bounds = array<i64: 3>, scalar_prefetch = 0 : i64, scratch_operands = 1 : i64, tpu.core_type = #tpu.core_type<tc>, window_params = [{transform_indices = @transform_0, window_bounds = array<i64: 8, 512>}, {transform_indices = @transform_1, window_bounds = array<i64: 512, 256>}, {pipeline_mode = #tpu.pipeline_mode<synchronous>, transform_indices = @transform_2, window_bounds = array<i64: 1, 256>}, {pipeline_mode = #tpu.pipeline_mode<synchronous>, transform_indices = @transform_3, window_bounds = array<i64: 256, 64>}, {pipeline_mode = #tpu.pipeline_mode<synchronous>, transform_indices = @transform_4, window_bounds = array<i64: 1, 64>}, {pipeline_mode = #tpu.pipeline_mode<synchronous>, transform_indices = @transform_5, window_bounds = array<i64: 64, 1>}, {pipeline_mode = #tpu.pipeline_mode<synchronous>, transform_indices = @transform_6, window_bounds = array<i64: 1, 1>}, {pipeline_mode = #tpu.pipeline_mode<synchronous>, transform_indices = @transform_7, window_bounds = array<i64: 8, 1>}]} {
    %c0_i32 = arith.constant 0 : i32
    %0 = arith.cmpi eq, %arg0, %c0_i32 : i32
    %1 = arith.extui %0 : i1 to i32
    %c0_i32_0 = arith.constant 0 : i32
    %2 = arith.cmpi ne, %1, %c0_i32_0 : i32
    scf.if %2 {
      %cst_9 = arith.constant 0.000000e+00 : f32
      %12 = vector.broadcast %cst_9 : f32 to vector<8x256xf32>
      %c0_10 = arith.constant 0 : index
      %c0_11 = arith.constant 0 : index
      %13 = vector.load %arg9[%c0_10, %c0_11] : memref<8x256xf32, #tpu.memory_space<vmem>>, vector<8x256xf32>
      tpu.vector_store %arg9[%c0_10, %c0_11], %12 {strides = array<i32>} : memref<8x256xf32, #tpu.memory_space<vmem>>, vector<8x256xf32>,
    } else {
    }
    %c0 = arith.constant 0 : index
    %c0_1 = arith.constant 0 : index
    %3 = vector.load %arg9[%c0, %c0_1] : memref<8x256xf32, #tpu.memory_space<vmem>>, vector<8x256xf32>
    %c0_2 = arith.constant 0 : index
    %c0_3 = arith.constant 0 : index
    %4 = vector.load %arg1[%c0_2, %c0_3] : memref<8x512xbf16, #tpu.memory_space<vmem>>, vector<8x512xbf16>
    %c0_4 = arith.constant 0 : index
    %c0_5 = arith.constant 0 : index
    %5 = vector.load %arg2[%c0_4, %c0_5] : memref<512x256xbf16, #tpu.memory_space<vmem>>, vector<512x256xbf16>
    %cst = arith.constant dense<0.000000e+00> : vector<8x256xf32>
    %6 = tpu.matmul %4, %5, %cst {dimension_numbers = #tpu.dot_dimension_numbers<[1], [0], [0], [1], [0, 0, 1, 1], [], []>} : vector<8x512xbf16>, vector<512x256xbf16>, vector<8x256xf32> -> vector<8x256xf32>
    %7 = arith.addf %3, %6 : vector<8x256xf32>
    %c0_6 = arith.constant 0 : index
    %c0_7 = arith.constant 0 : index
    %8 = vector.load %arg9[%c0_6, %c0_7] : memref<8x256xf32, #tpu.memory_space<vmem>>, vector<8x256xf32>
    tpu.vector_store %arg9[%c0_6, %c0_7], %7 {strides = array<i32>} : memref<8x256xf32, #tpu.memory_space<vmem>>, vector<8x256xf32>,
    %c2_i32 = arith.constant 2 : i32
    %9 = arith.cmpi eq, %arg0, %c2_i32 : i32
    %10 = arith.extui %9 : i1 to i32
    %c0_i32_8 = arith.constant 0 : i32
    %11 = arith.cmpi ne, %10, %c0_i32_8 : i32
    scf.if %11 {
      %c0_9 = arith.constant 0 : index
      %c0_10 = arith.constant 0 : index
      %12 = vector.load %arg9[%c0_9, %c0_10] : memref<8x256xf32, #tpu.memory_space<vmem>>, vector<8x256xf32>
      %c0_11 = arith.constant 0 : index
      %c0_12 = arith.constant 0 : index
      %13 = vector.load %arg3[%c0_11, %c0_12] : memref<1x256xf32, #tpu.memory_space<vmem>>, vector<1x256xf32>
      %14 = vector.broadcast %13 : vector<1x256xf32> to vector<8x256xf32>
      %15 = arith.addf %12, %14 : vector<8x256xf32>
      %cst_13 = arith.constant 0.000000e+00 : f32
      %16 = vector.broadcast %cst_13 : f32 to vector<8x256xf32>
      %17 = arith.maximumf %15, %16 : vector<8x256xf32>
      %18 = arith.truncf %17 : vector<8x256xf32> to vector<8x256xbf16>
      %c0_14 = arith.constant 0 : index
      %c0_15 = arith.constant 0 : index
      %19 = vector.load %arg4[%c0_14, %c0_15] : memref<256x64xbf16, #tpu.memory_space<vmem>>, vector<256x64xbf16>
      %cst_16 = arith.constant dense<0.000000e+00> : vector<8x64xf32>
      %20 = tpu.matmul %18, %19, %cst_16 {dimension_numbers = #tpu.dot_dimension_numbers<[1], [0], [0], [1], [0, 0, 1, 1], [], []>} : vector<8x256xbf16>, vector<256x64xbf16>, vector<8x64xf32> -> vector<8x64xf32>
      %c0_17 = arith.constant 0 : index
      %c0_18 = arith.constant 0 : index
      %21 = vector.load %arg5[%c0_17, %c0_18] : memref<1x64xf32, #tpu.memory_space<vmem>>, vector<1x64xf32>
      %22 = vector.broadcast %21 : vector<1x64xf32> to vector<8x64xf32>
      %23 = arith.addf %20, %22 : vector<8x64xf32>
      %cst_19 = arith.constant 0.000000e+00 : f32
      %24 = vector.broadcast %cst_19 : f32 to vector<8x64xf32>
      %25 = arith.maximumf %23, %24 : vector<8x64xf32>
      %26 = arith.truncf %25 : vector<8x64xf32> to vector<8x64xbf16>
      %c0_20 = arith.constant 0 : index
      %c0_21 = arith.constant 0 : index
      %27 = vector.load %arg6[%c0_20, %c0_21] : memref<64x1xbf16, #tpu.memory_space<vmem>>, vector<64x1xbf16>
      %cst_22 = arith.constant dense<0.000000e+00> : vector<8x1xf32>
      %28 = tpu.matmul %26, %27, %cst_22 {dimension_numbers = #tpu.dot_dimension_numbers<[1], [0], [0], [1], [0, 0, 1, 1], [], []>} : vector<8x64xbf16>, vector<64x1xbf16>, vector<8x1xf32> -> vector<8x1xf32>
      %c0_23 = arith.constant 0 : index
      %c0_24 = arith.constant 0 : index
      %29 = vector.load %arg7[%c0_23, %c0_24] : memref<1x1xf32, #tpu.memory_space<vmem>>, vector<1x1xf32>
      %30 = vector.broadcast %29 : vector<1x1xf32> to vector<8x1xf32>
      %31 = arith.addf %28, %30 : vector<8x1xf32>
      %c0_25 = arith.constant 0 : index
      %c0_26 = arith.constant 0 : index
      %32 = vector.load %arg8[%c0_25, %c0_26] : memref<8x1xf32, #tpu.memory_space<vmem>>, vector<8x1xf32>
      tpu.vector_store %arg8[%c0_25, %c0_26], %31 {strides = array<i32>} : memref<8x1xf32, #tpu.memory_space<vmem>>, vector<8x1xf32>,
    } else {
    }
    return
  }
  func.func @transform_0(%arg0: i32) -> (i32, i32) {
    %c0_i32 = arith.constant 0 : i32
    %c0_i32_0 = arith.constant 0 : i32
    return %c0_i32, %arg0 : i32, i32
  }
  func.func @transform_1(%arg0: i32) -> (i32, i32) {
    %c0_i32 = arith.constant 0 : i32
    %c0_i32_0 = arith.constant 0 : i32
    return %arg0, %c0_i32 : i32, i32
  }
  func.func @transform_2(%arg0: i32) -> (i32, i32) {
    %c0_i32 = arith.constant 0 : i32
    %c0_i32_0 = arith.constant 0 : i32
    %c0_i32_1 = arith.constant 0 : i32
    return %c0_i32, %c0_i32_0 : i32, i32
  }
  func.func @transform_3(%arg0: i32) -> (i32, i32) {
    %c0_i32 = arith.constant 0 : i32
    %c0_i32_0 = arith.constant 0 : i32
    %c0_i32_1 = arith.constant 0 : i32
    return %c0_i32, %c0_i32_0 : i32, i32
  }
  func.func @transform_4(%arg0: i32) -> (i32, i32) {
    %c0_i32 = arith.constant 0 : i32
    %c0_i32_0 = arith.constant 0 : i32
    %c0_i32_1 = arith.constant 0 : i32
    return %c0_i32, %c0_i32_0 : i32, i32
  }
  func.func @transform_5(%arg0: i32) -> (i32, i32) {
    %c0_i32 = arith.constant 0 : i32
    %c0_i32_0 = arith.constant 0 : i32
    %c0_i32_1 = arith.constant 0 : i32
    return %c0_i32, %c0_i32_0 : i32, i32
  }
  func.func @transform_6(%arg0: i32) -> (i32, i32) {
    %c0_i32 = arith.constant 0 : i32
    %c0_i32_0 = arith.constant 0 : i32
    %c0_i32_1 = arith.constant 0 : i32
    return %c0_i32, %c0_i32_0 : i32, i32
  }
  func.func @transform_7(%arg0: i32) -> (i32, i32) {
    %c0_i32 = arith.constant 0 : i32
    %c0_i32_0 = arith.constant 0 : i32
    %c0_i32_1 = arith.constant 0 : i32
    return %c0_i32, %c0_i32_0 : i32, i32
  }
}

</mosaic_0001>

<bundles_post_ra>
// kernel: forward.3
= control target key start
LH: loop header
LB: loop body
LE: loop exit
PB: predicated region body
PF: predicated region fallthrough
CT: control target
= control target key end

     0   :  { %s909_s12 = smov 0   ;;  %s911_s13 = smov 0   ;;  %s1006_s0 = inlined_call_operand.vmem [shape: bf16[2,81,768], index: 0, kind: input, shape index: {}]   ;;  %s1007_s1 = inlined_call_operand.vmem [shape: bf16[16,81], index: 1, kind: input, shape index: {}]   ;;  %s1008_s2 = inlined_call_operand.vmem [shape: f32[16,1], index: 2, kind: input, shape index: {}]   ;;  %s1009_s3 = inlined_call_operand.vmem [shape: bf16[2,16,768], index: 3, kind: output, shape index: {}]  }
   0x1   :  { %s913_s14 = smov 0  }
   0x2 LB: > { %s25_s15 = sadd.s32 1, %s882_s13  ;;  %p727_p0 = scmp.ge.s32.totalorder %s886_s14, 1  ;;  %s886_s14 = sphi %s913_s14, %s13_s14   ;;  %s882_s13 = sphi %s911_s13, %s1011_s13   ;;  %s878_s12 = sphi %s909_s12, %s1010_s12  }
   0x3   : > { %p27_p1 = scmp.ge.s32.totalorder %s25_s15, 2  ;;  %p158_p2 = scmp.lt.s32.totalorder %s886_s14, 3 }
   0x5   : > { %s1013_s15 = smov (%p27_p1, %s25_s15), 0  ;;  %p159_p3 = pnand %p727_p0, %p158_p2 }
   0x6   : > { %p191_p4 = scmp.lt.s32.totalorder (!%p159_p3), %s878_s12, 1  ;;  %v888_v0 = vmov (!%p159_p3), 0   ;;  %v246_v1 = vld [vmem:[%s1008_s2] sm:$0xff] (!%p159_p3)  ;;  %v247_v2 = vld [vmem:[%s1008_s2 + $0x8] sm:$0xff] (!%p159_p3)  ;;  %vm432_vm0 = vcmask (!%p159_p3), 1040384   ;;  %vm428_vm1 = vcmask (!%p159_p3), 662528  }
   0x7   : > { %162 = sbr.rel (%p159_p3) target bundleno = 289 (0x121), region = 32  ;;  %485 = vmatprep.mubr.bf16.mxu0 (!%p159_p3), %v888_v0  ;;  %528 = vmatprep.mubr.bf16.mxu1 (!%p159_p3), %v888_v0  ;;  %v434_v19 = vsel (!%p159_p3), %vm432_vm0, 65535, %v888_v0  ;;  %v832_v31 = vld [vmem:[%s1007_s1] sm:$0xff] (!%p159_p3)  }
   0x8   : > { %811 = vset.pattern.permute.xlu0 (!%p159_p3), %v888_v0 }
   0x9   : > { %250 = vperm.xlu0 (!%p159_p3), %811, %v246_v1  }
   0xd   : > { %255 = vperm.xlu0 (!%p159_p3), %811, %v247_v2  }
   0xe   : > { %s1015_s12 = smov (!%p191_p4, %s878_s12), 1 }
   0xf   : > { %s784_s18 = smul.u32 264, %s1015_s12 }
  0x10   : > { %s785_s26 = smul.u32 48, %s1015_s12 }
  0x11   : > { %s942_s23 = scalar_lea.vmem %s1006_s0, %s784_s18 }
  0x12   : > { %v812_v3 = vld [vmem:[%s942_s23 + $0x4] ss:$24 sps:$4 sm:$0xff]   ;;  %v814_v4 = vld [vmem:[%s942_s23] ss:$24 sps:$4 sm:$0xff]   ;;  %v815_v5 = vld [vmem:[%s942_s23 + $0x34] ss:$24 sps:$4 sm:$0xff]   ;;  %s989_s29 = scalar_lea.vmem %s1009_s3, %s785_s26 }
  0x13   : > { %453 = vmatprep.subr.bf16.mxu0 %v812_v3  ;;  %v817_v6 = vld [vmem:[%s942_s23 + $0x30] ss:$24 sps:$4 sm:$0xff]   ;;  %v818_v7 = vld [vmem:[%s942_s23 + $0x64] ss:$24 sps:$4 sm:$0xff]   ;;  %v820_v8 = vld [vmem:[%s942_s23 + $0x60] ss:$24 sps:$4 sm:$0xff]  }
  0x14   : > { %454 = vmatpush1.bf16.msra.mxu0 %v814_v4  ;;  %v821_v9 = vld [vmem:[%s942_s23 + $0x94] ss:$24 sps:$4 sm:$0xff]   ;;  %v831_v12 = vld [vmem:[%s942_s23 + $0x8] ss:$24 sps:$4 sm:$0xff]   ;;  %v838_v15 = vld [vmem:[%s942_s23 + $0x38] ss:$24 sps:$4 sm:$0xff]  }
  0x15   : > { %455 = vmatprep.subr.bf16.mxu0 %v815_v5  ;;  %v243_v10 = vld [vmem:[%s942_s23 + $0xf0] sm:$0x11]  ;;  %v828_v11 = vld [vmem:[%s942_s23 + $0xc] ss:$24 sps:$4 sm:$0xff]   ;;  %v844_v20 = vld [vmem:[%s942_s23 + $0x68] ss:$24 sps:$4 sm:$0xff]  }
  0x16   : > { %496 = vmatprep.subr.bf16.mxu1 %v828_v11  ;;  %v833_v13 = vld [vmem:[%s942_s23 + $0x3c] ss:$24 sps:$4 sm:$0xff]   ;;  %v823_v14 = vld [vmem:[%s942_s23 + $0x90] ss:$24 sps:$4 sm:$0xff]   ;;  %v839_v16 = vld [vmem:[%s942_s23 + $0x6c] ss:$24 sps:$4 sm:$0xff]   ;;  %v762_v18 = vcombine.high %v243_v10, %v243_v10  ;;  %v761_v22 = vcombine.low %v243_v10, %v243_v10 }
  0x17   : > { %497 = vmatpush1.bf16.msra.mxu1 %v831_v12  ;;  %v824_v17 = vld [vmem:[%s942_s23 + $0xc4] ss:$24 sps:$4 sm:$0xff]   ;;  %v826_v21 = vld [vmem:[%s942_s23 + $0xc0] ss:$24 sps:$4 sm:$0xff]   ;;  %v837_v29 = vld [vmem:[%s942_s23 + $0x14] ss:$24 sps:$4 sm:$0xff]  }
  0x18   : > { %456 = vmatpush1.bf16.msra.mxu0 %v817_v6  ;;  %498 = vmatprep.subr.bf16.mxu1 %v833_v13  ;;  %v845_v23 = vld [vmem:[%s942_s23 + $0x9c] ss:$24 sps:$4 sm:$0xff]   ;;  %v439_v24 = vand.u32 %v762_v18, %v434_v19  ;;  %v850_v25 = vld [vmem:[%s942_s23 + $0x98] ss:$24 sps:$4 sm:$0xff]   ;;  %v851_v26 = vld [vmem:[%s942_s23 + $0xcc] ss:$24 sps:$4 sm:$0xff]   ;;  %v436_v27 = vand.u32 %v761_v22, %v434_v19 }
  0x19   : > { %457 = vmatprep.subr.bf16.mxu0 %v818_v7  ;;  %v244_v28 = vld [vmem:[%s942_s23 + $0xf8] sm:$0x11]  ;;  %v856_v32 = vld [vmem:[%s942_s23 + $0xc8] ss:$24 sps:$4 sm:$0xff]   ;;  %v849_v39 = vld [vmem:[%s942_s23 + $0x74] ss:$24 sps:$4 sm:$0xff]  }
  0x1a   : > { %v764_v30 = vcombine.high %v244_v28, %v244_v28  ;;  %v763_v33 = vcombine.low %v244_v28, %v244_v28  ;;  %v835_v34 = vld [vmem:[%s942_s23 + $0x10] ss:$24 sps:$4 sm:$0xff]   ;;  %v843_v36 = vld [vmem:[%s942_s23 + $0x44] ss:$24 sps:$4 sm:$0xff]   ;;  %v841_v38 = vld [vmem:[%s942_s23 + $0x40] ss:$24 sps:$4 sm:$0xff]  }
  0x1b   : > { %499 = vmatpush1.bf16.msra.mxu1 %v838_v15  ;;  %v847_v40 = vld [vmem:[%s942_s23 + $0x70] ss:$24 sps:$4 sm:$0xff]   ;;  %v855_v41 = vld [vmem:[%s942_s23 + $0xa4] ss:$24 sps:$4 sm:$0xff]   ;;  %v853_v43 = vld [vmem:[%s942_s23 + $0xa0] ss:$24 sps:$4 sm:$0xff]  }
  0x1c   : > { %458 = vmatpush1.bf16.msra.mxu0 %v820_v8  ;;  %500 = vmatprep.subr.bf16.mxu1 %v839_v16  ;;  %v445_v35 = vand.u32 %v764_v30, %v434_v19  ;;  %v442_v37 = vand.u32 %v763_v33, %v434_v19  ;;  %v245_v42 = vld [vmem:[%s942_s23 + $0x100] sm:$0x11]  ;;  %v860_v44 = vld [vmem:[%s942_s23 + $0xd4] ss:$24 sps:$4 sm:$0xff]   ;;  %v858_v46 = vld [vmem:[%s942_s23 + $0xd0] ss:$24 sps:$4 sm:$0xff]  }
  0x1d   : > { %459 = vmatprep.subr.bf16.mxu0 %v821_v9  ;;  %v766_v45 = vcombine.high %v245_v42, %v245_v42  ;;  %v765_v47 = vcombine.low %v245_v42, %v245_v42 }
  0x1f   : > { %501 = vmatpush1.bf16.msra.mxu1 %v844_v20  ;;  %v451_v48 = vand.u32 %v766_v45, %v434_v19  ;;  %v448_v49 = vand.u32 %v765_v47, %v434_v19 }
  0x20   : > { %460 = vmatpush1.bf16.msra.mxu0 %v823_v14  ;;  %502 = vmatprep.subr.bf16.mxu1 %v845_v23 }
  0x21   : > { %461 = vmatprep.subr.bf16.mxu0 %v824_v17 }
  0x23   : > { %503 = vmatpush1.bf16.msra.mxu1 %v850_v25 }
  0x24   : > { %462 = vmatpush1.bf16.msra.mxu0 %v826_v21  ;;  %504 = vmatprep.subr.bf16.mxu1 %v851_v26 }
  0x25   : > { %463 = vmatprep.subr.bf16.mxu0 %v439_v24 }
  0x27   : > { %505 = vmatpush1.bf16.msra.mxu1 %v856_v32 }
  0x28   : > { %464 = vmatpush1.bf16.msra.mxu0 %v436_v27  ;;  %506 = vmatprep.subr.bf16.mxu1 %v445_v35 }
  0x29   : > { %539 = vmatprep.subr.bf16.mxu0 %v837_v29 }
  0x2b   : > { %767 = vmatmul.mubr.msk.bf16.vlgmr.msra.gmra.mrb[0].mxu0 %vm428_vm1, %v832_v31  ;;  %507 = vmatpush1.bf16.msra.mxu1 %v442_v37 }
  0x2c   : > { %540 = vmatpush1.bf16.msra.mxu0 %v835_v34  ;;  %571 = vmatprep.mubr.bf16.mxu0 %v888_v0 }
  0x2d   : > { %541 = vmatprep.subr.bf16.mxu0 %v843_v36 }
  0x2e   : > { %768 = vmatmul.mubr.msk.bf16.vlgmr.msra.gmra.mrb[0].mxu1 %vm428_vm1, %v832_v31 }
  0x30   : > { %542 = vmatpush1.bf16.msra.mxu0 %v841_v38 }
  0x31   : > { %543 = vmatprep.subr.bf16.mxu0 %v849_v39 }
  0x34   : > { %544 = vmatpush1.bf16.msra.mxu0 %v847_v40 }
  0x35   : > { %545 = vmatprep.subr.bf16.mxu0 %v855_v41 }
  0x38   : > { %546 = vmatpush1.bf16.msra.mxu0 %v853_v43 }
  0x39   : > { %547 = vmatprep.subr.bf16.mxu0 %v860_v44 }
  0x3c   : > { %548 = vmatpush1.bf16.msra.mxu0 %v858_v46 }
  0x3d   : > { %549 = vmatprep.subr.bf16.mxu0 %v451_v48 }
  0x40   : > { %550 = vmatpush1.bf16.msra.mxu0 %v448_v49 }
  0x43   : > { %769 = vmatmul.mubr.msk.bf16.vlgmr.msra.gmra.mrb[4].mxu0 %vm428_vm1, %v832_v31 }
  0x88   : > { %v251_v50 = vpop.permute.xlu0 %250 }
  0x8c   : > { %v256_v52 = vpop.permute.xlu0 %255 }
  0xfe   : > { %v487_v51 = vpop.f32.mrb[0].mxu0 }
  0xff   : > { %v488_v53 = vadd.f32 %v487_v51, %v251_v50  ;;  %v489_v54 = vpop.f32.mrb[1].mxu0 }
 0x100   : > { %v490_v55 = vadd.f32 %v489_v54, %v251_v50  ;;  %v491_v56 = vpop.f32.mrb[2].mxu0 }
 0x101   : > { %v582_v57 = vmax.f32 %v488_v53, 0.0  ;;  %v492_v58 = vadd.f32 %v491_v56, %v256_v52  ;;  %v493_v59 = vpop.f32.mrb[3].mxu0  ;;  %v530_v1 = vpop.f32.mrb[0].mxu1 }
 0x102   : > { %v583_v60 = vmax.f32 %v490_v55, 0.0  ;;  %v494_v61 = vadd.f32 %v493_v59, %v256_v52  ;;  %v531_v3 = vadd.f32 %v530_v1, %v251_v50  ;;  %v532_v4 = vpop.f32.mrb[1].mxu1 }
 0x103   : > { %v588_v62 = vmax.f32 %v492_v58, 0.0  ;;  %v533_v5 = vadd.f32 %v532_v4, %v251_v50  ;;  %v534_v6 = vpop.f32.mrb[2].mxu1 }
 0x104   : > { %v778_v63 = vpack.c.bf16 %v583_v60, %v582_v57  ;;  %v589_v0 = vmax.f32 %v494_v61, 0.0  ;;  %v584_v7 = vmax.f32 %v531_v3, 0.0  ;;  %v535_v8 = vadd.f32 %v534_v6, %v256_v52  ;;  %v536_v9 = vpop.f32.mrb[3].mxu1 }
 0x105   : > { %v585_v10 = vmax.f32 %v533_v5, 0.0  ;;  %v537_v11 = vadd.f32 %v536_v9, %v256_v52 }
 0x106   : > { %630 = vst [vmem:[%s989_s29] sm:$0xff] %v778_v63  ;;  %v781_v2 = vpack.c.bf16 %v589_v0, %v588_v62  ;;  %v590_v12 = vmax.f32 %v535_v8, 0.0 }
 0x107   : > { %v779_v13 = vpack.c.bf16 %v585_v10, %v584_v7  ;;  %v591_v14 = vmax.f32 %v537_v11, 0.0 }
 0x108   : > { %633 = vst [vmem:[%s989_s29 + $0x18] sm:$0xff] %v781_v2 }
 0x109   : > { %631 = vst [vmem:[%s989_s29 + $0x8] sm:$0xff] %v779_v13  ;;  %v782_v15 = vpack.c.bf16 %v591_v14, %v590_v12 }
 0x10b   : > { %634 = vst [vmem:[%s989_s29 + $0x20] sm:$0xff] %v782_v15 }
 0x116   : > { %v573_v16 = vpop.f32.mrb[4].mxu0 }
 0x117   : > { %v574_v17 = vadd.f32 %v573_v16, %v251_v50  ;;  %v575_v18 = vpop.f32.mrb[5].mxu0 }
 0x118   : > { %v576_v19 = vadd.f32 %v575_v18, %v251_v50  ;;  %v577_v20 = vpop.f32.mrb[6].mxu0 }
 0x119   : > { %v586_v21 = vmax.f32 %v574_v17, 0.0  ;;  %v578_v22 = vadd.f32 %v577_v20, %v256_v52  ;;  %v579_v23 = vpop.f32.mrb[7].mxu0 }
 0x11a   : > { %v587_v24 = vmax.f32 %v576_v19, 0.0  ;;  %v580_v25 = vadd.f32 %v579_v23, %v256_v52 }
 0x11b   : > { %v592_v26 = vmax.f32 %v578_v22, 0.0 }
 0x11c   : > { %v780_v27 = vpack.c.bf16 %v587_v24, %v586_v21  ;;  %v593_v28 = vmax.f32 %v580_v25, 0.0 }
 0x11e   : > { %632 = vst [vmem:[%s989_s29 + $0x10] sm:$0xff] %v780_v27  ;;  %v783_v29 = vpack.c.bf16 %v593_v28, %v592_v26 }
 0x120   : > { %635 = vst [vmem:[%s989_s29 + $0x28] sm:$0xff] %v783_v29 }
 0x121 PF: > { %s13_s14 = sadd.s32 1, %s886_s14   ;;  %s1010_s12 = smov %s882_s13 }
 0x122   : > { %p10_p5 = scmp.ge.s32.totalorder %s13_s14, 4   ;;  %s1011_s13 = smov %s1013_s15 }
 0x124   :  { %12 = sbr.rel (!%p10_p5) target bundleno = 2 (0x2), region = 62 }

// kernel: forward.4
= control target key start
LH: loop header
LB: loop body
LE: loop exit
PB: predicated region body
PF: predicated region fallthrough
CT: control target
= control target key end

     0   :  { %s2283_s12 = smov 0   ;;  %s2285_s13 = smov 0   ;;  %s2586_s0 = inlined_call_operand.vmem [shape: bf16[2,4,432,128], index: 0, kind: input, shape index: {}]   ;;  %s2587_s1 = inlined_call_operand.vmem [shape: bf16[32,432], index: 1, kind: input, shape index: {}]   ;;  %s2588_s2 = inlined_call_operand.vmem [shape: f32[32,1], index: 2, kind: input, shape index: {}]   ;;  %s2589_s3 = inlined_call_operand.vmem [shape: bf16[2,32,128], index: 3, kind: output, shape index: {}]  }
   0x1   :  { %s2287_s14 = smov 0  }
   0x2 LB: > { %s25_s15 = sadd.s32 1, %s2256_s13  ;;  %p1666_p0 = scmp.ge.s32.totalorder %s2260_s14, 1  ;;  %s2260_s14 = sphi %s2287_s14, %s13_s14   ;;  %s2256_s13 = sphi %s2285_s13, %s2591_s13   ;;  %s2252_s12 = sphi %s2283_s12, %s2590_s12  }
   0x3   : > { %p27_p1 = scmp.ge.s32.totalorder %s25_s15, 2  ;;  %p156_p2 = scmp.lt.s32.totalorder %s2260_s14, 3 }
   0x5   : > { %s2593_s15 = smov (%p27_p1, %s25_s15), 0  ;;  %p157_p3 = pnand %p1666_p0, %p156_p2 }
   0x6   : > { %p186_p4 = scmp.lt.s32.totalorder (!%p157_p3), %s2252_s12, 1  ;;  %v2304_v0 = vld [vmem:[%s2587_s1 + $0x4] ss:$16 sps:$4 sm:$0xff] (!%p157_p3)   ;;  %v2262_v1 = vmov (!%p157_p3), 0   ;;  %v2351_v32 = vld [vmem:[%s2587_s1] ss:$16 sps:$4 sm:$0xff] (!%p157_p3)  }
   0x7   : > { %160 = sbr.rel (%p157_p3) target bundleno = 418 (0x1a2), region = 32  ;;  %2116 = vset.pattern.permute.xlu0 (!%p157_p3), %v2262_v1  ;;  %2117 = vset.pattern.permute.xlu1 (!%p157_p3), %v2262_v1  ;;  %v2359_v36 = vld [vmem:[%s2587_s1 + $0x24] ss:$16 sps:$4 sm:$0xff] (!%p157_p3)   ;;  %v2375_v43 = vld [vmem:[%s2587_s1 + $0x20] ss:$16 sps:$4 sm:$0xff] (!%p157_p3)   ;;  %vm465_vm0 = vcmask (!%p157_p3), 392192  }
   0x8   : > { %504 = vmatprep.mubr.bf16.mxu1 (!%p157_p3), %v2304_v0  ;;  %819 = vmatprep.mubr.bf16.mxu0 (!%p157_p3), %v2304_v0  ;;  %v2386_v47 = vld [vmem:[%s2587_s1 + $0xc] ss:$16 sps:$4 sm:$0xff] (!%p157_p3)  }
   0xe   : > { %s2595_s12 = smov (!%p186_p4, %s2252_s12), 1 }
   0xf   : > { %s2090_s18 = smul.u32 864, %s2595_s12 }
  0x11   : > { %s2316_s21 = scalar_lea.vmem %s2586_s0, %s2090_s18 }
  0x12   : > { %v2118_v2 = vld [vmem:[%s2316_s21 + $0x40] sm:$0xff]   ;;  %v2119_v3 = vld [vmem:[%s2316_s21 + $0x118] sm:$0xff]   ;;  %v2122_v6 = vld [vmem:[%s2316_s21 + $0x48] sm:$0xff]  }
  0x13   : > { %1978 = vmatprep.subr.bf16.mxu1 %v2118_v2  ;;  %v2120_v4 = vld [vmem:[%s2316_s21] sm:$0xff]   ;;  %2006 = vmatprep.subr.bf16.mxu0 %v2119_v3  ;;  %v2121_v5 = vld [vmem:[%s2316_s21 + $0xd8] sm:$0xff]   ;;  %v2124_v8 = vld [vmem:[%s2316_s21 + $0x8] sm:$0xff]  }
  0x14   : > { %1979 = vmatpush3.bf16.msra.mxu1 %v2120_v4  ;;  %2007 = vmatpush3.bf16.msra.mxu0 %v2121_v5  ;;  %v2123_v7 = vld [vmem:[%s2316_s21 + $0x120] sm:$0xff]   ;;  %v2126_v10 = vld [vmem:[%s2316_s21 + $0x50] sm:$0xff]   ;;  %v2127_v11 = vld [vmem:[%s2316_s21 + $0x128] sm:$0xff]  }
  0x15   : > { %1980 = vmatprep.subr.bf16.mxu1 %v2122_v6  ;;  %2008 = vmatprep.subr.bf16.mxu0 %v2123_v7  ;;  %v2125_v9 = vld [vmem:[%s2316_s21 + $0xe0] sm:$0xff]   ;;  %v2128_v12 = vld [vmem:[%s2316_s21 + $0x10] sm:$0xff]   ;;  %v2129_v13 = vld [vmem:[%s2316_s21 + $0xe8] sm:$0xff]  }
  0x16   : > { %v2130_v14 = vld [vmem:[%s2316_s21 + $0x58] sm:$0xff]   ;;  %v2131_v15 = vld [vmem:[%s2316_s21 + $0x130] sm:$0xff]   ;;  %v2134_v18 = vld [vmem:[%s2316_s21 + $0x60] sm:$0xff]  }
  0x17   : > { %v2132_v16 = vld [vmem:[%s2316_s21 + $0x18] sm:$0xff]   ;;  %v2133_v17 = vld [vmem:[%s2316_s21 + $0xf0] sm:$0xff]   ;;  %v2136_v20 = vld [vmem:[%s2316_s21 + $0x20] sm:$0xff]  }
  0x18   : > { %1981 = vmatpush3.bf16.msra.mxu1 %v2124_v8  ;;  %2009 = vmatpush3.bf16.msra.mxu0 %v2125_v9  ;;  %v2135_v19 = vld [vmem:[%s2316_s21 + $0x138] sm:$0xff]   ;;  %v2138_v22 = vld [vmem:[%s2316_s21 + $0x68] sm:$0xff]   ;;  %v2139_v23 = vld [vmem:[%s2316_s21 + $0x140] sm:$0xff]  }
  0x19   : > { %1982 = vmatprep.subr.bf16.mxu1 %v2126_v10  ;;  %2010 = vmatprep.subr.bf16.mxu0 %v2127_v11  ;;  %v2137_v21 = vld [vmem:[%s2316_s21 + $0xf8] sm:$0xff]   ;;  %v2140_v24 = vld [vmem:[%s2316_s21 + $0x28] sm:$0xff]   ;;  %v2141_v25 = vld [vmem:[%s2316_s21 + $0x100] sm:$0xff]  }
  0x1a   : > { %v2142_v26 = vld [vmem:[%s2316_s21 + $0x70] sm:$0xff]   ;;  %v2143_v27 = vld [vmem:[%s2316_s21 + $0x148] sm:$0xff]   ;;  %v2146_v30 = vld [vmem:[%s2316_s21 + $0x78] sm:$0xff]  }
  0x1b   : > { %v2144_v28 = vld [vmem:[%s2316_s21 + $0x30] sm:$0xff]   ;;  %v2145_v29 = vld [vmem:[%s2316_s21 + $0x108] sm:$0xff]   ;;  %v2148_v33 = vld [vmem:[%s2316_s21 + $0x38] sm:$0xff]  }
  0x1c   : > { %1983 = vmatpush3.bf16.msra.mxu1 %v2128_v12  ;;  %2011 = vmatpush3.bf16.msra.mxu0 %v2129_v13  ;;  %v2147_v31 = vld [vmem:[%s2316_s21 + $0x150] sm:$0xff]   ;;  %v2154_v37 = vld [vmem:[%s2316_s21 + $0x80] sm:$0xff]   ;;  %v2156_v39 = vld [vmem:[%s2316_s21 + $0x1f8] sm:$0xff]  }
  0x1d   : > { %1984 = vmatprep.subr.bf16.mxu1 %v2130_v14  ;;  %2012 = vmatprep.subr.bf16.mxu0 %v2131_v15  ;;  %v2149_v34 = vld [vmem:[%s2316_s21 + $0x110] sm:$0xff]   ;;  %v2157_v40 = vld [vmem:[%s2316_s21 + $0x88] sm:$0xff]   ;;  %v2158_v41 = vld [vmem:[%s2316_s21 + $0x1b8] sm:$0xff]  }
  0x1e   : > { %v2153_v35 = vld [vmem:[%s2316_s21 + $0x1f0] sm:$0xff]   ;;  %v2159_v42 = vld [vmem:[%s2316_s21 + $0x200] sm:$0xff]   ;;  %v2162_v46 = vld [vmem:[%s2316_s21 + $0x208] sm:$0xff]  }
  0x1f   : > { %v2155_v38 = vld [vmem:[%s2316_s21 + $0x1b0] sm:$0xff]   ;;  %v2161_v45 = vld [vmem:[%s2316_s21 + $0x1c0] sm:$0xff]   ;;  %v2163_v48 = vld [vmem:[%s2316_s21 + $0x98] sm:$0xff]  }
  0x20   : > { %1985 = vmatpush3.bf16.msra.mxu1 %v2132_v16  ;;  %2013 = vmatpush3.bf16.msra.mxu0 %v2133_v17  ;;  %v2160_v44 = vld [vmem:[%s2316_s21 + $0x90] sm:$0xff]   ;;  %v2164_v49 = vld [vmem:[%s2316_s21 + $0x1c8] sm:$0xff]   ;;  %v2166_v51 = vld [vmem:[%s2316_s21 + $0xa0] sm:$0xff]  }
  0x21   : > { %1986 = vmatprep.subr.bf16.mxu1 %v2134_v18  ;;  %2014 = vmatprep.subr.bf16.mxu0 %v2135_v19  ;;  %v2165_v50 = vld [vmem:[%s2316_s21 + $0x210] sm:$0xff]   ;;  %v2168_v53 = vld [vmem:[%s2316_s21 + $0x218] sm:$0xff]   ;;  %v2169_v54 = vld [vmem:[%s2316_s21 + $0xa8] sm:$0xff]  }
  0x22   : > { %v2167_v52 = vld [vmem:[%s2316_s21 + $0x1d0] sm:$0xff]   ;;  %v2170_v55 = vld [vmem:[%s2316_s21 + $0x1d8] sm:$0xff]   ;;  %v2173_v56 = vld [vmem:[%s2316_s21 + $0x220] sm:$0xff]  }
  0x23   : > { %v2174_v57 = vld [vmem:[%s2316_s21 + $0xb0] sm:$0xff]   ;;  %v2176_v58 = vld [vmem:[%s2316_s21 + $0x1e0] sm:$0xff]   ;;  %v2177_v59 = vld [vmem:[%s2316_s21 + $0x228] sm:$0xff]  }
  0x24   : > { %1987 = vmatpush3.bf16.msra.mxu1 %v2136_v20  ;;  %2015 = vmatpush3.bf16.msra.mxu0 %v2137_v21  ;;  %v2178_v60 = vld [vmem:[%s2316_s21 + $0xb8] sm:$0xff]   ;;  %v2179_v61 = vld [vmem:[%s2316_s21 + $0x1e8] sm:$0xff]   ;;  %v2181_v63 = vld [vmem:[%s2316_s21 + $0xc0] sm:$0xff]  }
  0x25   : > { %1988 = vmatprep.subr.bf16.mxu1 %v2138_v22  ;;  %2016 = vmatprep.subr.bf16.mxu0 %v2139_v23  ;;  %v2180_v62 = vld [vmem:[%s2316_s21 + $0x2c8] sm:$0xff]   ;;  %v2183_v3 = vld [vmem:[%s2316_s21 + $0x2d0] sm:$0xff]   ;;  %v2186_v6 = vld [vmem:[%s2316_s21 + $0x2d8] sm:$0xff]  }
  0x26   : > { %v2182_v2 = vld [vmem:[%s2316_s21 + $0x288] sm:$0xff]   ;;  %v2185_v5 = vld [vmem:[%s2316_s21 + $0x290] sm:$0xff]   ;;  %v2188_v8 = vld [vmem:[%s2316_s21 + $0x298] sm:$0xff]  }
  0x27   : > { %v2184_v4 = vld [vmem:[%s2316_s21 + $0xc8] sm:$0xff]   ;;  %v2187_v7 = vld [vmem:[%s2316_s21 + $0xd0] sm:$0xff]   ;;  %v2192_v10 = vld [vmem:[%s2316_s21 + $0x2e0] sm:$0xff]  }
  0x28   : > { %1989 = vmatpush3.bf16.msra.mxu1 %v2140_v24  ;;  %2017 = vmatpush3.bf16.msra.mxu0 %v2141_v25  ;;  %v2428_v9 = vld [vmem:[%s2587_s1 + $0x8] ss:$16 sps:$4 sm:$0xff]   ;;  %v2434_v11 = vld [vmem:[%s2587_s1 + $0x2c] ss:$16 sps:$4 sm:$0xff]   ;;  %v2194_v13 = vld [vmem:[%s2316_s21 + $0x2a0] sm:$0xff]  }
  0x29   : > { %1990 = vmatprep.subr.bf16.mxu1 %v2142_v26  ;;  %2018 = vmatprep.subr.bf16.mxu0 %v2143_v27  ;;  %v2193_v12 = vld [vmem:[%s2316_s21 + $0x158] sm:$0xff]   ;;  %v2195_v14 = vld [vmem:[%s2316_s21 + $0x2e8] sm:$0xff]   ;;  %v2196_v15 = vld [vmem:[%s2316_s21 + $0x160] sm:$0xff]  }
  0x2a   : > { %v2197_v16 = vld [vmem:[%s2316_s21 + $0x2a8] sm:$0xff]   ;;  %v2201_v17 = vld [vmem:[%s2316_s21 + $0x2f0] sm:$0xff]   ;;  %v2204_v20 = vld [vmem:[%s2316_s21 + $0x2f8] sm:$0xff]  }
  0x2b   : > { %v2202_v18 = vld [vmem:[%s2316_s21 + $0x168] sm:$0xff]   ;;  %v2203_v19 = vld [vmem:[%s2316_s21 + $0x2b0] sm:$0xff]   ;;  %v2206_v22 = vld [vmem:[%s2316_s21 + $0x2b8] sm:$0xff]  }
  0x2c   : > { %1991 = vmatpush3.bf16.msra.mxu1 %v2144_v28  ;;  %2019 = vmatpush3.bf16.msra.mxu0 %v2145_v29  ;;  %v2205_v21 = vld [vmem:[%s2316_s21 + $0x170] sm:$0xff]   ;;  %v2207_v23 = vld [vmem:[%s2316_s21 + $0x300] sm:$0xff]   ;;  %v2208_v24 = vld [vmem:[%s2316_s21 + $0x178] sm:$0xff]  }
  0x2d   : > { %1992 = vmatprep.subr.bf16.mxu1 %v2146_v30  ;;  %2020 = vmatprep.subr.bf16.mxu0 %v2147_v31  ;;  %v2209_v25 = vld [vmem:[%s2316_s21 + $0x2c0] sm:$0xff]   ;;  %v2211_v27 = vld [vmem:[%s2316_s21 + $0x308] sm:$0xff]   ;;  %v2213_v29 = vld [vmem:[%s2316_s21 + $0x310] sm:$0xff]  }
  0x2e   : > { %v2210_v26 = vld [vmem:[%s2316_s21 + $0x180] sm:$0xff]   ;;  %v2212_v28 = vld [vmem:[%s2316_s21 + $0x188] sm:$0xff]   ;;  %v2214_v30 = vld [vmem:[%s2316_s21 + $0x190] sm:$0xff]  }
  0x2f   : > { %v2215_v31 = vld [vmem:[%s2316_s21 + $0x318] sm:$0xff]  }
  0x30   : > { %1993 = vmatpush3.bf16.msra.mxu1 %v2148_v33  ;;  %2021 = vmatpush3.bf16.msra.mxu0 %v2149_v34  ;;  %v2217_v33 = vld [vmem:[%s2316_s21 + $0x320] sm:$0xff]  }
  0x31   : > { %521 = vmatprep.subr.bf16.mxu1 %v2262_v1  ;;  %2034 = vmatprep.subr.bf16.mxu0 %v2153_v35  ;;  %v2218_v34 = vld [vmem:[%s2316_s21 + $0x1a0] sm:$0xff]   ;;  %v2219_v35 = vld [vmem:[%s2316_s21 + $0x328] sm:$0xff]  }
  0x33   : > { %505 = vmatmul.mubr.bf16.vlgmr.msra.gmra.mrb[0].mxu1 %v2351_v32  ;;  %820 = vmatmul.mubr.bf16.vlgmr.msra.gmra.mrb[0].mxu0 %v2351_v32 }
  0x34   : > { %522 = vmatpush1.bf16.msra.mxu1 %v2154_v37  ;;  %2035 = vmatpush3.bf16.msra.mxu0 %v2155_v38  ;;  %v2221_v37 = vld [vmem:[%s2316_s21 + $0x330] sm:$0xff]  }
  0x35   : > { %523 = vmatprep.subr.bf16.mxu1 %v2262_v1  ;;  %2036 = vmatprep.subr.bf16.mxu0 %v2156_v39  ;;  %v2222_v38 = vld [vmem:[%s2316_s21 + $0x230] sm:$0xff]   ;;  %v2223_v39 = vld [vmem:[%s2316_s21 + $0x338] sm:$0xff]  }
  0x36   : > { %827 = vmatprep.mubr.bf16.mxu0 %v2359_v36  ;;  %512 = vmatprep.mubr.bf16.mxu1 %v2359_v36 }
  0x38   : > { %524 = vmatpush1.bf16.msra.mxu1 %v2157_v40  ;;  %2037 = vmatpush3.bf16.msra.mxu0 %v2158_v41  ;;  %v1527_v40 = vld [vmem:[%s2588_s2] sm:$0xff]  ;;  %v1529_v41 = vld [vmem:[%s2588_s2 + $0x10] sm:$0xff] }
  0x39   : > { %525 = vmatprep.subr.bf16.mxu1 %v2262_v1  ;;  %2038 = vmatprep.subr.bf16.mxu0 %v2159_v42  ;;  %v2224_v42 = vld [vmem:[%s2316_s21 + $0x238] sm:$0xff]  }
  0x3a   : > { %1533 = vperm.xlu0 %2116, %v1527_v40   ;;  %1543 = vperm.xlu1 %2117, %v1529_v41  }
  0x3b   : > { %513 = vmatmul.mubr.bf16.gmra.mrb[4].mxu1 %v2375_v43  ;;  %828 = vmatmul.mubr.bf16.gmra.mrb[4].mxu0 %v2375_v43 }
  0x3c   : > { %526 = vmatpush1.bf16.msra.mxu1 %v2160_v44  ;;  %2039 = vmatpush3.bf16.msra.mxu0 %v2161_v45  ;;  %v2225_v44 = vld [vmem:[%s2316_s21 + $0x340] sm:$0xff]   ;;  %v1530_v45 = vld [vmem:[%s2588_s2 + $0x18] sm:$0xff] }
  0x3d   : > { %527 = vmatprep.subr.bf16.mxu1 %v2262_v1  ;;  %2040 = vmatprep.subr.bf16.mxu0 %v2162_v46  ;;  %v2226_v46 = vld [vmem:[%s2316_s21 + $0x240] sm:$0xff]  }
  0x3e   : > { %1134 = vmatprep.mubr.bf16.mxu0 %v2304_v0  ;;  %1705 = vmatprep.mubr.msk.bf16.mxu1 %vm465_vm0, %v2386_v47 }
  0x3f   : > { %1548 = vperm.xlu1 %2117, %v1530_v45  }
  0x40   : > { %528 = vmatpush1.bf16.msra.mxu1 %v2163_v48  ;;  %2041 = vmatpush3.bf16.msra.mxu0 %v2164_v49  ;;  %v2227_v48 = vld [vmem:[%s2316_s21 + $0x348] sm:$0xff]  }
  0x41   : > { %529 = vmatprep.subr.bf16.mxu1 %v2262_v1  ;;  %2042 = vmatprep.subr.bf16.mxu0 %v2165_v50  ;;  %v2228_v49 = vld [vmem:[%s2316_s21 + $0x248] sm:$0xff]   ;;  %v2229_v50 = vld [vmem:[%s2316_s21 + $0x350] sm:$0xff]  }
  0x44   : > { %530 = vmatpush1.bf16.msra.mxu1 %v2166_v51  ;;  %2043 = vmatpush3.bf16.msra.mxu0 %v2167_v52  ;;  %v2230_v51 = vld [vmem:[%s2316_s21 + $0x250] sm:$0xff]   ;;  %v2231_v52 = vld [vmem:[%s2316_s21 + $0x358] sm:$0xff]  }
  0x45   : > { %531 = vmatprep.subr.bf16.mxu1 %v2262_v1  ;;  %2044 = vmatprep.subr.bf16.mxu0 %v2168_v53  ;;  %v2232_v53 = vld [vmem:[%s2316_s21 + $0x258] sm:$0xff]  }
  0x48   : > { %532 = vmatpush1.bf16.msra.mxu1 %v2169_v54  ;;  %2045 = vmatpush3.bf16.msra.mxu0 %v2170_v55  ;;  %v2234_v54 = vld [vmem:[%s2316_s21 + $0x268] sm:$0xff]   ;;  %v2235_v55 = vld [vmem:[%s2316_s21 + $0x270] sm:$0xff]  }
  0x49   : > { %533 = vmatprep.subr.bf16.mxu1 %v2262_v1  ;;  %2046 = vmatprep.subr.bf16.mxu0 %v2173_v56  ;;  %v2236_v56 = vld [vmem:[%s2316_s21 + $0x278] sm:$0xff]  }
  0x4c   : > { %534 = vmatpush1.bf16.msra.mxu1 %v2174_v57  ;;  %2047 = vmatpush3.bf16.msra.mxu0 %v2176_v58  ;;  %v2237_v57 = vld [vmem:[%s2316_s21 + $0x280] sm:$0xff]  }
  0x4d   : > { %535 = vmatprep.subr.bf16.mxu1 %v2262_v1  ;;  %2048 = vmatprep.subr.bf16.mxu0 %v2177_v59 }
  0x50   : > { %536 = vmatpush1.bf16.msra.mxu1 %v2178_v60  ;;  %2049 = vmatpush3.bf16.msra.mxu0 %v2179_v61 }
  0x51   : > { %537 = vmatprep.subr.bf16.mxu1 %v2262_v1  ;;  %2062 = vmatprep.subr.bf16.mxu0 %v2180_v62 }
  0x53   : > { %1135 = vmatmul.mubr.bf16.vlgmr.msra.gmra.mrb[8].mxu0 %v2351_v32 }
  0x54   : > { %538 = vmatpush1.bf16.msra.mxu1 %v2181_v63  ;;  %2063 = vmatpush3.bf16.msra.mxu0 %v2182_v2 }
  0x55   : > { %539 = vmatprep.subr.bf16.mxu1 %v2262_v1  ;;  %2064 = vmatprep.subr.bf16.mxu0 %v2183_v3 }
  0x56   : > { %1142 = vmatprep.mubr.bf16.mxu0 %v2359_v36 }
  0x58   : > { %540 = vmatpush1.bf16.msra.mxu1 %v2184_v4  ;;  %2065 = vmatpush3.bf16.msra.mxu0 %v2185_v5 }
  0x59   : > { %541 = vmatprep.subr.bf16.mxu1 %v2262_v1  ;;  %2066 = vmatprep.subr.bf16.mxu0 %v2186_v6 }
  0x5b   : > { %1143 = vmatmul.mubr.bf16.gmra.mrb[12].mxu0 %v2375_v43 }
  0x5c   : > { %542 = vmatpush1.bf16.msra.mxu1 %v2187_v7  ;;  %2067 = vmatpush3.bf16.msra.mxu0 %v2188_v8 }
  0x5d   : > { %836 = vmatprep.subr.bf16.mxu1 %v2262_v1  ;;  %2068 = vmatprep.subr.bf16.mxu0 %v2192_v10 }
  0x5e   : > { %1449 = vmatprep.mubr.bf16.mxu0 %v2304_v0  ;;  %v2452_v0 = vld [vmem:[%s2587_s1 + $0x28] ss:$16 sps:$4 sm:$0xff]  }
  0x5f   : > { %554 = vmatmul.mubr.bf16.vlgmr.msra.gmra.mrb[8].mxu1 %v2428_v9 }
  0x60   : > { %837 = vmatpush1.bf16.msra.mxu1 %v2193_v12  ;;  %1706 = vmatprep.mubr.msk.bf16.mxu1 %vm465_vm0, %v2434_v11 }
  0x61   : > { %2069 = vmatpush3.bf16.msra.mxu0 %v2194_v13  ;;  %838 = vmatprep.subr.bf16.mxu1 %v2262_v1 }
  0x62   : > { %2070 = vmatprep.subr.bf16.mxu0 %v2195_v14 }
  0x64   : > { %839 = vmatpush1.bf16.msra.mxu1 %v2196_v15 }
  0x65   : > { %2071 = vmatpush3.bf16.msra.mxu0 %v2197_v16  ;;  %840 = vmatprep.subr.bf16.mxu1 %v2262_v1 }
  0x66   : > { %2072 = vmatprep.subr.bf16.mxu0 %v2201_v17 }
  0x67   : > { %562 = vmatmul.mubr.bf16.gmra.mrb[12].mxu1 %v2452_v0 }
  0x68   : > { %841 = vmatpush1.bf16.msra.mxu1 %v2202_v18  ;;  %1788 = vmatprep.mubr.msk.bf16.mxu1 %vm465_vm0, %v2386_v47 }
  0x69   : > { %2073 = vmatpush3.bf16.msra.mxu0 %v2203_v19  ;;  %842 = vmatprep.subr.bf16.mxu1 %v2262_v1 }
  0x6a   : > { %2074 = vmatprep.subr.bf16.mxu0 %v2204_v20 }
  0x6c   : > { %843 = vmatpush1.bf16.msra.mxu1 %v2205_v21 }
  0x6d   : > { %2075 = vmatpush3.bf16.msra.mxu0 %v2206_v22  ;;  %844 = vmatprep.subr.bf16.mxu1 %v2262_v1 }
  0x6e   : > { %2076 = vmatprep.subr.bf16.mxu0 %v2207_v23 }
  0x70   : > { %845 = vmatpush1.bf16.msra.mxu1 %v2208_v24 }
  0x71   : > { %2077 = vmatpush3.bf16.msra.mxu0 %v2209_v25  ;;  %846 = vmatprep.subr.bf16.mxu1 %v2262_v1 }
  0x72   : > { %1466 = vmatprep.subr.bf16.mxu0 %v2262_v1 }
  0x74   : > { %847 = vmatpush1.bf16.msra.mxu1 %v2210_v26  ;;  %1450 = vmatmul.mubr.bf16.vlgmr.msra.gmra.mrb[16].mxu0 %v2351_v32  ;;  %v2216_v32 = vld [vmem:[%s2316_s21 + $0x198] sm:$0xff]  }
  0x75   : > { %1467 = vmatpush1.bf16.msra.mxu0 %v2211_v27  ;;  %848 = vmatprep.subr.bf16.mxu1 %v2262_v1 }
  0x76   : > { %1468 = vmatprep.subr.bf16.mxu0 %v2262_v1  ;;  %1457 = vmatprep.mubr.bf16.mxu0 %v2359_v36  ;;  %v2220_v36 = vld [vmem:[%s2316_s21 + $0x1a8] sm:$0xff]  }
  0x78   : > { %849 = vmatpush1.bf16.msra.mxu1 %v2212_v28 }
  0x79   : > { %1469 = vmatpush1.bf16.msra.mxu0 %v2213_v29  ;;  %850 = vmatprep.subr.bf16.mxu1 %v2262_v1 }
  0x7a   : > { %1470 = vmatprep.subr.bf16.mxu0 %v2262_v1 }
  0x7c   : > { %851 = vmatpush1.bf16.msra.mxu1 %v2214_v30  ;;  %1458 = vmatmul.mubr.bf16.gmra.mrb[20].mxu0 %v2375_v43  ;;  %v1528_v43 = vld [vmem:[%s2588_s2 + $0x8] sm:$0xff] }
  0x7d   : > { %1471 = vmatpush1.bf16.msra.mxu0 %v2215_v31  ;;  %852 = vmatprep.subr.bf16.mxu1 %v2262_v1 }
  0x7e   : > { %1472 = vmatprep.subr.bf16.mxu0 %v2262_v1  ;;  %1954 = vmatprep.mubr.msk.bf16.mxu0 %vm465_vm0, %v2386_v47 }
  0x7f   : > { %1538 = vperm.xlu0 %2116, %v1528_v43  }
  0x80   : > { %853 = vmatpush1.bf16.msra.mxu1 %v2216_v32 }
  0x81   : > { %1473 = vmatpush1.bf16.msra.mxu0 %v2217_v33  ;;  %854 = vmatprep.subr.bf16.mxu1 %v2262_v1 }
  0x82   : > { %1474 = vmatprep.subr.bf16.mxu0 %v2262_v1 }
  0x84   : > { %855 = vmatpush1.bf16.msra.mxu1 %v2218_v34 }
  0x85   : > { %1475 = vmatpush1.bf16.msra.mxu0 %v2219_v35  ;;  %856 = vmatprep.subr.bf16.mxu1 %v2262_v1 }
  0x86   : > { %1476 = vmatprep.subr.bf16.mxu0 %v2262_v1 }
  0x88   : > { %857 = vmatpush1.bf16.msra.mxu1 %v2220_v36 }
  0x89   : > { %1477 = vmatpush1.bf16.msra.mxu0 %v2221_v37  ;;  %1151 = vmatprep.subr.bf16.mxu1 %v2262_v1 }
  0x8a   : > { %1478 = vmatprep.subr.bf16.mxu0 %v2262_v1 }
  0x8b   : > { %869 = vmatmul.mubr.bf16.vlgmr.msra.gmra.mrb[16].mxu1 %v2428_v9 }
  0x8c   : > { %1152 = vmatpush1.bf16.msra.mxu1 %v2222_v38  ;;  %1789 = vmatprep.mubr.msk.bf16.mxu1 %vm465_vm0, %v2434_v11 }
  0x8d   : > { %1479 = vmatpush1.bf16.msra.mxu0 %v2223_v39  ;;  %1153 = vmatprep.subr.bf16.mxu1 %v2262_v1 }
  0x8e   : > { %1480 = vmatprep.subr.bf16.mxu0 %v2262_v1 }
  0x90   : > { %1154 = vmatpush1.bf16.msra.mxu1 %v2224_v42 }
  0x91   : > { %1481 = vmatpush1.bf16.msra.mxu0 %v2225_v44  ;;  %1155 = vmatprep.subr.bf16.mxu1 %v2262_v1 }
  0x92   : > { %1482 = vmatprep.subr.bf16.mxu0 %v2262_v1 }
  0x93   : > { %877 = vmatmul.mubr.bf16.gmra.mrb[20].mxu1 %v2452_v0 }
  0x94   : > { %1156 = vmatpush1.bf16.msra.mxu1 %v2226_v46  ;;  %1871 = vmatprep.mubr.msk.bf16.mxu1 %vm465_vm0, %v2386_v47  ;;  %v2233_v47 = vld [vmem:[%s2316_s21 + $0x260] sm:$0xff]   ;;  %s1962_s21 = sshll.u32 %s2595_s12, 4 }
  0x95   : > { %1483 = vmatpush1.bf16.msra.mxu0 %v2227_v48  ;;  %1157 = vmatprep.subr.bf16.mxu1 %v2262_v1  ;;  %s201_s24 = scalar_lea.vmem %s2589_s3, %s1962_s21 }
  0x96   : > { %1484 = vmatprep.subr.bf16.mxu0 %v2262_v1 }
  0x98   : > { %1158 = vmatpush1.bf16.msra.mxu1 %v2228_v49 }
  0x99   : > { %1485 = vmatpush1.bf16.msra.mxu0 %v2229_v50  ;;  %1159 = vmatprep.subr.bf16.mxu1 %v2262_v1 }
  0x9a   : > { %1486 = vmatprep.subr.bf16.mxu0 %v2262_v1 }
  0x9c   : > { %1160 = vmatpush1.bf16.msra.mxu1 %v2230_v51 }
  0x9d   : > { %1487 = vmatpush1.bf16.msra.mxu0 %v2231_v52  ;;  %1161 = vmatprep.subr.bf16.mxu1 %v2262_v1 }
  0xa0   : > { %1499 = vmatmul.mubr.bf16.vlgmr.msra.gmra.mrb[24].mxu0 %v2428_v9  ;;  %1162 = vmatpush1.bf16.msra.mxu1 %v2232_v53 }
  0xa1   : > { %1163 = vmatprep.subr.bf16.mxu1 %v2262_v1  ;;  %1955 = vmatprep.mubr.msk.bf16.mxu0 %vm465_vm0, %v2434_v11 }
  0xa4   : > { %1164 = vmatpush1.bf16.msra.mxu1 %v2233_v47 }
  0xa5   : > { %1165 = vmatprep.subr.bf16.mxu1 %v2262_v1 }
  0xa8   : > { %1166 = vmatpush1.bf16.msra.mxu1 %v2234_v54  ;;  %1507 = vmatmul.mubr.bf16.gmra.mrb[28].mxu0 %v2452_v0 }
  0xa9   : > { %1167 = vmatprep.subr.bf16.mxu1 %v2262_v1 }
  0xac   : > { %1168 = vmatpush1.bf16.msra.mxu1 %v2235_v55 }
  0xad   : > { %1169 = vmatprep.subr.bf16.mxu1 %v2262_v1 }
  0xb0   : > { %1170 = vmatpush1.bf16.msra.mxu1 %v2236_v56 }
  0xb1   : > { %1171 = vmatprep.subr.bf16.mxu1 %v2262_v1 }
  0xb4   : > { %1172 = vmatpush1.bf16.msra.mxu1 %v2237_v57 }
  0xb7   : > { %1184 = vmatmul.mubr.bf16.vlgmr.msra.gmra.mrb[24].mxu1 %v2428_v9 }
  0xb8   : > { %1872 = vmatprep.mubr.msk.bf16.mxu1 %vm465_vm0, %v2434_v11 }
  0xbf   : > { %1192 = vmatmul.mubr.bf16.gmra.mrb[28].mxu1 %v2452_v0 }
 0x106   : > { %v1994_v58 = vpop.f32.mrb[0].mxu1  ;;  %v2022_v60 = vpop.f32.mrb[0].mxu0 }
 0x107   : > { %v1995_v59 = vpop.f32.mrb[1].mxu1  ;;  %v2023_v63 = vpop.f32.mrb[1].mxu0 }
 0x108   : > { %v1996_v61 = vadd.f32 %v1995_v59, %v1994_v58  ;;  %v1997_v62 = vpop.f32.mrb[2].mxu1  ;;  %v2024_v3 = vadd.f32 %v2023_v63, %v2022_v60  ;;  %v2025_v4 = vpop.f32.mrb[2].mxu0 }
 0x109   : > { %v1998_v2 = vpop.f32.mrb[3].mxu1  ;;  %v2026_v6 = vpop.f32.mrb[3].mxu0 }
 0x10a   : > { %v1999_v5 = vadd.f32 %v1998_v2, %v1997_v62  ;;  %v2027_v1 = vadd.f32 %v2026_v6, %v2025_v4 }
 0x10e   : > { %v2000_v7 = vpop.f32.mrb[4].mxu1  ;;  %v2028_v9 = vpop.f32.mrb[4].mxu0 }
 0x10f   : > { %v2001_v8 = vpop.f32.mrb[5].mxu1  ;;  %v2029_v11 = vpop.f32.mrb[5].mxu0 }
 0x110   : > { %v2002_v10 = vadd.f32 %v2001_v8, %v2000_v7  ;;  %v2003_v12 = vpop.f32.mrb[6].mxu1  ;;  %v2030_v14 = vadd.f32 %v2029_v11, %v2028_v9  ;;  %v2031_v15 = vpop.f32.mrb[6].mxu0 }
 0x111   : > { %v2004_v13 = vpop.f32.mrb[7].mxu1  ;;  %v2032_v17 = vpop.f32.mrb[7].mxu0 }
 0x112   : > { %v2005_v16 = vadd.f32 %v2004_v13, %v2003_v12  ;;  %v2033_v0 = vadd.f32 %v2032_v17, %v2031_v15 }
 0x126   : > { %v2050_v18 = vpop.f32.mrb[8].mxu0 }
 0x127   : > { %v2051_v19 = vpop.f32.mrb[9].mxu0 }
 0x128   : > { %v2555_v20 = vadd.f32 %v2051_v19, %v2050_v18  ;;  %v2053_v21 = vpop.f32.mrb[10].mxu0 }
 0x129   : > { %v2054_v22 = vpop.f32.mrb[11].mxu0 }
 0x12a   : > { %v2557_v23 = vadd.f32 %v2054_v22, %v2053_v21  ;;  %v1534_v21 = vpop.permute.xlu0 %1533 }
 0x12e   : > { %v2056_v24 = vpop.f32.mrb[12].mxu0 }
 0x12f   : > { %v2057_v25 = vpop.f32.mrb[13].mxu0 }
 0x130   : > { %v2559_v26 = vadd.f32 %v2057_v25, %v2056_v24  ;;  %v2059_v27 = vpop.f32.mrb[14].mxu0 }
 0x131   : > { %v2060_v29 = vpop.f32.mrb[15].mxu0 }
 0x132   : > { %v555_v28 = vpop.f32.mrb[8].mxu1  ;;  %v2561_v32 = vadd.f32 %v2060_v29, %v2059_v27 }
 0x133   : > { %v556_v30 = vadd.f32 %v1996_v61, %v555_v28  ;;  %v557_v31 = vpop.f32.mrb[9].mxu1 }
 0x134   : > { %v558_v33 = vpop.f32.mrb[10].mxu1  ;;  %v1539_v31 = vpop.permute.xlu0 %1538 }
 0x135   : > { %v559_v34 = vadd.f32 %v1999_v5, %v558_v33  ;;  %v560_v35 = vpop.f32.mrb[11].mxu1 }
 0x13a   : > { %v563_v36 = vpop.f32.mrb[12].mxu1 }
 0x13b   : > { %v2563_v37 = vadd.f32 %v2002_v10, %v563_v36  ;;  %v565_v38 = vpop.f32.mrb[13].mxu1 }
 0x13c   : > { %v566_v39 = vpop.f32.mrb[14].mxu1 }
 0x13d   : > { %v2565_v40 = vadd.f32 %v2005_v16, %v566_v39  ;;  %v568_v41 = vpop.f32.mrb[15].mxu1  ;;  %v1544_v39 = vpop.permute.xlu1 %1543 }
 0x147   : > { %v2078_v42 = vpop.f32.mrb[16].mxu0 }
 0x148   : > { %v2079_v43 = vpop.f32.mrb[17].mxu0 }
 0x149   : > { %v2080_v44 = vadd.f32 %v2079_v43, %v2078_v42  ;;  %v2081_v45 = vpop.f32.mrb[18].mxu0 }
 0x14a   : > { %v2082_v46 = vpop.f32.mrb[19].mxu0 }
 0x14b   : > { %v2083_v48 = vadd.f32 %v2082_v46, %v2081_v45 }
 0x14f   : > { %v2084_v49 = vpop.f32.mrb[20].mxu0 }
 0x150   : > { %v2085_v50 = vpop.f32.mrb[21].mxu0 }
 0x151   : > { %v2086_v51 = vadd.f32 %v2085_v50, %v2084_v49  ;;  %v2087_v52 = vpop.f32.mrb[22].mxu0 }
 0x152   : > { %v2088_v53 = vpop.f32.mrb[23].mxu0 }
 0x153   : > { %v2089_v47 = vadd.f32 %v2088_v53, %v2087_v52 }
 0x15e   : > { %v870_v54 = vpop.f32.mrb[16].mxu1 }
 0x15f   : > { %v871_v55 = vadd.f32 %v2024_v3, %v870_v54  ;;  %v872_v56 = vpop.f32.mrb[17].mxu1 }
 0x160   : > { %v873_v57 = vpop.f32.mrb[18].mxu1 }
 0x161   : > { %v1515_v58 = vmax.f32 %v556_v30, %v871_v55  ;;  %v874_v59 = vadd.f32 %v2027_v1, %v873_v57  ;;  %v875_v60 = vpop.f32.mrb[19].mxu1 }
 0x163   : > { %v1516_v61 = vmax.f32 %v559_v34, %v874_v59 }
 0x166   : > { %v878_v62 = vpop.f32.mrb[20].mxu1 }
 0x167   : > { %v879_v63 = vadd.f32 %v2030_v14, %v878_v62  ;;  %v880_v2 = vpop.f32.mrb[21].mxu1 }
 0x168   : > { %v881_v4 = vpop.f32.mrb[22].mxu1 }
 0x169   : > { %v1517_v5 = vmax.f32 %v2563_v37, %v879_v63  ;;  %v882_v6 = vadd.f32 %v2033_v0, %v881_v4  ;;  %v883_v7 = vpop.f32.mrb[23].mxu1 }
 0x16b   : > { %v1518_v8 = vmax.f32 %v2565_v40, %v882_v6 }
 0x173   : > { %v1500_v9 = vpop.f32.mrb[24].mxu0 }
 0x174   : > { %v1501_v10 = vadd.f32 %v2080_v44, %v1500_v9  ;;  %v1502_v12 = vpop.f32.mrb[25].mxu0 }
 0x175   : > { %v1503_v3 = vpop.f32.mrb[26].mxu0 }
 0x176   : > { %v1504_v11 = vadd.f32 %v2083_v48, %v1503_v3  ;;  %v1505_v13 = vpop.f32.mrb[27].mxu0 }
 0x17b   : > { %v1508_v15 = vpop.f32.mrb[28].mxu0 }
 0x17c   : > { %v1509_v1 = vadd.f32 %v2086_v51, %v1508_v15  ;;  %v1510_v16 = vpop.f32.mrb[29].mxu0 }
 0x17d   : > { %v1511_v17 = vpop.f32.mrb[30].mxu0 }
 0x17e   : > { %v1512_v18 = vadd.f32 %v2089_v47, %v1511_v17  ;;  %v1513_v14 = vpop.f32.mrb[31].mxu0 }
 0x18a   : > { %v1185_v19 = vpop.f32.mrb[24].mxu1 }
 0x18b   : > { %v1186_v0 = vadd.f32 %v2555_v20, %v1185_v19  ;;  %v1187_v22 = vpop.f32.mrb[25].mxu1 }
 0x18c   : > { %v1188_v24 = vpop.f32.mrb[26].mxu1 }
 0x18d   : > { %v1519_v25 = vmax.f32 %v1186_v0, %v1501_v10  ;;  %v1189_v27 = vadd.f32 %v2557_v23, %v1188_v24  ;;  %v1190_v28 = vpop.f32.mrb[27].mxu1 }
 0x18f   : > { %v1520_v29 = vmax.f32 %v1189_v27, %v1504_v11  ;;  %v1523_v30 = vmax.f32 %v1515_v58, %v1519_v25 }
 0x191   : > { %v1551_v33 = vadd.f32 %v1534_v21, %v1523_v30  ;;  %v1524_v34 = vmax.f32 %v1516_v61, %v1520_v29 }
 0x192   : > { %v1193_v35 = vpop.f32.mrb[28].mxu1 }
 0x193   : > { %v1552_v36 = vadd.f32 %v1539_v31, %v1524_v34  ;;  %v1194_v37 = vadd.f32 %v2559_v26, %v1193_v35  ;;  %v1195_v38 = vpop.f32.mrb[29].mxu1  ;;  %v1555_v20 = vmax.f32 %v1551_v33, 0.0  ;;  %v1549_v26 = vpop.permute.xlu1 %1548 }
 0x194   : > { %v1196_v40 = vpop.f32.mrb[30].mxu1 }
 0x195   : > { %v1556_v41 = vmax.f32 %v1552_v36, 0.0  ;;  %v1521_v42 = vmax.f32 %v1194_v37, %v1509_v1  ;;  %v1197_v43 = vadd.f32 %v2561_v32, %v1196_v40  ;;  %v1198_v23 = vpop.f32.mrb[31].mxu1 }
 0x197   : > { %v1970_v44 = vpack.c.bf16 %v1556_v41, %v1555_v20  ;;  %v1525_v45 = vmax.f32 %v1517_v5, %v1521_v42  ;;  %v1522_v46 = vmax.f32 %v1197_v43, %v1512_v18 }
 0x199   : > { %1971 = vst [vmem:[%s201_s24] sm:$0xff] %v1970_v44   ;;  %v1526_v48 = vmax.f32 %v1518_v8, %v1522_v46  ;;  %v1553_v49 = vadd.f32 %v1544_v39, %v1525_v45 }
 0x19b   : > { %v1554_v50 = vadd.f32 %v1549_v26, %v1526_v48  ;;  %v1557_v51 = vmax.f32 %v1553_v49, 0.0 }
 0x19d   : > { %v1558_v52 = vmax.f32 %v1554_v50, 0.0 }
 0x19f   : > { %v1975_v53 = vpack.c.bf16 %v1558_v52, %v1557_v51 }
 0x1a1   : > { %1977 = vst [vmem:[%s201_s24 + $0x8] sm:$0xff] %v1975_v53  }
 0x1a2 PF: > { %s13_s14 = sadd.s32 1, %s2260_s14   ;;  %s2590_s12 = smov %s2256_s13 }
 0x1a3   : > { %p10_p5 = scmp.ge.s32.totalorder %s13_s14, 4   ;;  %s2591_s13 = smov %s2593_s15 }
 0x1a5   :  { %12 = sbr.rel (!%p10_p5) target bundleno = 2 (0x2), region = 65 }

// kernel: forward.5
= control target key start
LH: loop header
LB: loop body
LE: loop exit
PB: predicated region body
PF: predicated region fallthrough
CT: control target
= control target key end

     0   :  { %s1443_s26 = smov 0   ;;  %s1605_s0 = inlined_call_operand.vmem [shape: bf16[8,1536], index: 0, kind: input, shape index: {}]   ;;  %s1606_s1 = inlined_call_operand.vmem [shape: bf16[1536,256], index: 1, kind: input, shape index: {}]   ;;  %s1607_s2 = inlined_call_operand.vmem [shape: f32[1,256], index: 2, kind: input, shape index: {}]   ;;  %s1608_s3 = inlined_call_operand.vmem [shape: bf16[256,64], index: 3, kind: input, shape index: {}]   ;;  %s1609_s4 = inlined_call_operand.vmem [shape: f32[1,64], index: 4, kind: input, shape index: {}]   ;;  %s1610_s5 = inlined_call_operand.vmem [shape: bf16[64,1], index: 5, kind: input, shape index: {}]   ;;  %s1611_s6 = inlined_call_operand.<no memory space> [shape: f32[1,1], index: 6, kind: input, shape index: {}]   ;;  %s1612_s7 = inlined_call_operand.vmem [shape: f32[8,1], index: 7, kind: output, shape index: {}]  }
   0x1   :  { %v12_v0 = vstv %s1611_s6 }
   0x2   :  { %13 = vst [vmem:[#allocation3] sm:$0x1] %v12_v0 }
   0x3 LB: > { %s1449_s27 = sadd.s32 4294967295, %s1395_s26   ;;  %p1117_p0 = scmp.ge.s32.totalorder %s1395_s26, 1  ;;  %s1395_s26 = sphi %s1443_s26, %s19_s26  }
   0x4   : > { %p247_p1 = scmp.lt.s32.totalorder %s1395_s26, 4 }
   0x6   : > { %p248_p2 = pnand %p1117_p0, %p247_p1 }
   0x7   : > { %s1118_s6 = sshll.u32 (!%p248_p2), %s1449_s27, 2  ;;  %s1120_s28 = sshll.u32 (!%p248_p2), %s1449_s27, 6 }
   0x8   : > { %251 = sbr.rel (%p248_p2) target bundleno = 759 (0x2f7), region = 48  ;;  %p281_p3 = scmp.lt.s32.totalorder (!%p248_p2), %s1118_s6, 11 }
   0x9   : > { %p287_p4 = scmp.lt.s32.totalorder (!%p248_p2), %s1120_s28, 191  ;;  %p1123_p5 = scmp.ne.s32.totalorder (!%p248_p2), %s1449_s27, 0 }
   0xf   : > { %s1614_s6 = smov (!%p281_p3, %s1118_s6), 11  ;;  %s1616_s28 = smov (!%p287_p4, %s1120_s28), 191 }
  0x10   : > { %s1119_s29 = sshll.u32 %s1614_s6, 2  ;;  %s1218_s10 = sshll.u32 %s1616_s28, 3  ;;  %v1397_v1 = vmov (!%p1123_p5), 0.0  }
  0x11   : > { %s1458_s9 = scalar_lea.vmem %s1605_s0, %s1119_s29  ;;  %s1463_s13 = scalar_lea.vmem %s1606_s1, %s1218_s10  ;;  %298 = vst [vmem:[#allocation2] sm:$0xff] (!%p1123_p5), %v1397_v1  ;;  %299 = vst [vmem:[#allocation2 + $0x8] sm:$0xff] (!%p1123_p5), %v1397_v1 }
  0x12   : > { %297 = sbr.rel (%p1123_p5) target bundleno = 25 (0x19), region = 52 }
  0x19 PF: > { %v1269_v2 = vld [vmem:[%s1463_s13 + $0x4] ss:$8 sps:$4 sm:$0xff]   ;;  %v1273_v4 = vld [vmem:[%s1463_s13] ss:$8 sps:$4 sm:$0xff]   ;;  %v1275_v6 = vld [vmem:[%s1463_s13 + $0x14] ss:$8 sps:$4 sm:$0xff]  }
  0x1a   : > { %v1271_v3 = vld [vmem:[%s1463_s13 + $0x104] ss:$8 sps:$4 sm:$0xff]   ;;  %702 = vmatprep.subr.bf16.mxu0 %v1269_v2  ;;  %v1274_v5 = vld [vmem:[%s1463_s13 + $0x100] ss:$8 sps:$4 sm:$0xff]   ;;  %v1277_v7 = vld [vmem:[%s1463_s13 + $0x114] ss:$8 sps:$4 sm:$0xff]  }
  0x1b   : > { %743 = vmatprep.subr.bf16.mxu1 %v1271_v3  ;;  %703 = vmatpush1.bf16.msra.mxu0 %v1273_v4  ;;  %v1279_v8 = vld [vmem:[%s1463_s13 + $0x10] ss:$8 sps:$4 sm:$0xff]   ;;  %v1281_v10 = vld [vmem:[%s1463_s13 + $0x24] ss:$8 sps:$4 sm:$0xff]   ;;  %v1285_v12 = vld [vmem:[%s1463_s13 + $0x20] ss:$8 sps:$4 sm:$0xff]  }
  0x1c   : > { %744 = vmatpush1.bf16.msra.mxu1 %v1274_v5  ;;  %704 = vmatprep.subr.bf16.mxu0 %v1275_v6  ;;  %v1280_v9 = vld [vmem:[%s1463_s13 + $0x110] ss:$8 sps:$4 sm:$0xff]   ;;  %v1283_v11 = vld [vmem:[%s1463_s13 + $0x124] ss:$8 sps:$4 sm:$0xff]   ;;  %v1286_v13 = vld [vmem:[%s1463_s13 + $0x120] ss:$8 sps:$4 sm:$0xff]  }
  0x1d   : > { %745 = vmatprep.subr.bf16.mxu1 %v1277_v7  ;;  %v1287_v14 = vld [vmem:[%s1463_s13 + $0x34] ss:$8 sps:$4 sm:$0xff]   ;;  %v1291_v16 = vld [vmem:[%s1463_s13 + $0x30] ss:$8 sps:$4 sm:$0xff]   ;;  %v1293_v18 = vld [vmem:[%s1463_s13 + $0x44] ss:$8 sps:$4 sm:$0xff]  }
  0x1e   : > { %v1289_v15 = vld [vmem:[%s1463_s13 + $0x134] ss:$8 sps:$4 sm:$0xff]   ;;  %v1292_v17 = vld [vmem:[%s1463_s13 + $0x130] ss:$8 sps:$4 sm:$0xff]   ;;  %v1295_v19 = vld [vmem:[%s1463_s13 + $0x144] ss:$8 sps:$4 sm:$0xff]  }
  0x1f   : > { %705 = vmatpush1.bf16.msra.mxu0 %v1279_v8  ;;  %v1297_v20 = vld [vmem:[%s1463_s13 + $0x40] ss:$8 sps:$4 sm:$0xff]   ;;  %v1299_v22 = vld [vmem:[%s1463_s13 + $0x54] ss:$8 sps:$4 sm:$0xff]   ;;  %v1303_v24 = vld [vmem:[%s1463_s13 + $0x50] ss:$8 sps:$4 sm:$0xff]  }
  0x20   : > { %746 = vmatpush1.bf16.msra.mxu1 %v1280_v9  ;;  %706 = vmatprep.subr.bf16.mxu0 %v1281_v10  ;;  %v1298_v21 = vld [vmem:[%s1463_s13 + $0x140] ss:$8 sps:$4 sm:$0xff]   ;;  %v1301_v23 = vld [vmem:[%s1463_s13 + $0x154] ss:$8 sps:$4 sm:$0xff]   ;;  %v1304_v25 = vld [vmem:[%s1463_s13 + $0x150] ss:$8 sps:$4 sm:$0xff]  }
  0x21   : > { %747 = vmatprep.subr.bf16.mxu1 %v1283_v11  ;;  %v1305_v26 = vld [vmem:[%s1463_s13 + $0x64] ss:$8 sps:$4 sm:$0xff]   ;;  %v1309_v28 = vld [vmem:[%s1463_s13 + $0x60] ss:$8 sps:$4 sm:$0xff]   ;;  %v1311_v30 = vld [vmem:[%s1463_s13 + $0x74] ss:$8 sps:$4 sm:$0xff]  }
  0x22   : > { %v1307_v27 = vld [vmem:[%s1463_s13 + $0x164] ss:$8 sps:$4 sm:$0xff]   ;;  %v1310_v29 = vld [vmem:[%s1463_s13 + $0x160] ss:$8 sps:$4 sm:$0xff]   ;;  %v1313_v31 = vld [vmem:[%s1463_s13 + $0x174] ss:$8 sps:$4 sm:$0xff]  }
  0x23   : > { %707 = vmatpush1.bf16.msra.mxu0 %v1285_v12  ;;  %v1315_v32 = vld [vmem:[%s1463_s13 + $0x70] ss:$8 sps:$4 sm:$0xff]   ;;  %v1317_v34 = vld [vmem:[%s1463_s13 + $0x84] ss:$8 sps:$4 sm:$0xff]   ;;  %v1321_v36 = vld [vmem:[%s1463_s13 + $0x80] ss:$8 sps:$4 sm:$0xff]  }
  0x24   : > { %748 = vmatpush1.bf16.msra.mxu1 %v1286_v13  ;;  %708 = vmatprep.subr.bf16.mxu0 %v1287_v14  ;;  %v1316_v33 = vld [vmem:[%s1463_s13 + $0x170] ss:$8 sps:$4 sm:$0xff]   ;;  %v1319_v35 = vld [vmem:[%s1463_s13 + $0x184] ss:$8 sps:$4 sm:$0xff]   ;;  %v1322_v37 = vld [vmem:[%s1463_s13 + $0x180] ss:$8 sps:$4 sm:$0xff]  }
  0x25   : > { %749 = vmatprep.subr.bf16.mxu1 %v1289_v15  ;;  %v1323_v38 = vld [vmem:[%s1463_s13 + $0x94] ss:$8 sps:$4 sm:$0xff]   ;;  %v1327_v40 = vld [vmem:[%s1463_s13 + $0x90] ss:$8 sps:$4 sm:$0xff]   ;;  %v1329_v42 = vld [vmem:[%s1463_s13 + $0xa4] ss:$8 sps:$4 sm:$0xff]  }
  0x26   : > { %v1325_v39 = vld [vmem:[%s1463_s13 + $0x194] ss:$8 sps:$4 sm:$0xff]   ;;  %v1328_v41 = vld [vmem:[%s1463_s13 + $0x190] ss:$8 sps:$4 sm:$0xff]   ;;  %v1331_v43 = vld [vmem:[%s1463_s13 + $0x1a4] ss:$8 sps:$4 sm:$0xff]  }
  0x27   : > { %709 = vmatpush1.bf16.msra.mxu0 %v1291_v16  ;;  %v1333_v44 = vld [vmem:[%s1463_s13 + $0xa0] ss:$8 sps:$4 sm:$0xff]   ;;  %v1335_v46 = vld [vmem:[%s1463_s13 + $0xb4] ss:$8 sps:$4 sm:$0xff]   ;;  %v1339_v51 = vld [vmem:[%s1463_s13 + $0xb0] ss:$8 sps:$4 sm:$0xff]  }
  0x28   : > { %750 = vmatpush1.bf16.msra.mxu1 %v1292_v17  ;;  %710 = vmatprep.subr.bf16.mxu0 %v1293_v18  ;;  %v1334_v45 = vld [vmem:[%s1463_s13 + $0x1a0] ss:$8 sps:$4 sm:$0xff]   ;;  %v1337_v47 = vld [vmem:[%s1463_s13 + $0x1b4] ss:$8 sps:$4 sm:$0xff]   ;;  %v1340_v52 = vld [vmem:[%s1463_s13 + $0x1b0] ss:$8 sps:$4 sm:$0xff]  }
  0x29   : > { %751 = vmatprep.subr.bf16.mxu1 %v1295_v19  ;;  %v302_v48 = vld [vmem:[%s1458_s9] sm:$0xff]  ;;  %v303_v50 = vld [vmem:[%s1458_s9 + $0x8] sm:$0xff]  ;;  %v1347_v58 = vld [vmem:[%s1463_s13 + $0xd4] ss:$8 sps:$4 sm:$0xff]   ;;  %p1192_p6 = scmp.ne.s32.totalorder %s1449_s27, 2 }
  0x2a   : > { %v1125_v49 = vcombine.high %v302_v48, %v302_v48  ;;  %v1127_v53 = vcombine.high %v303_v50, %v303_v50  ;;  %v1341_v54 = vld [vmem:[%s1463_s13 + $0xc4] ss:$8 sps:$4 sm:$0xff]   ;;  %v1345_v56 = vld [vmem:[%s1463_s13 + $0xc0] ss:$8 sps:$4 sm:$0xff]   ;;  %v1349_v59 = vld [vmem:[%s1463_s13 + $0x1d4] ss:$8 sps:$4 sm:$0xff]   ;;  %v1124_v6 = vcombine.low %v302_v48, %v302_v48  ;;  %v1126_v7 = vcombine.low %v303_v50, %v303_v50 }
  0x2b   : > { %711 = vmatpush1.bf16.msra.mxu0 %v1297_v20  ;;  %v1343_v55 = vld [vmem:[%s1463_s13 + $0x1c4] ss:$8 sps:$4 sm:$0xff]   ;;  %v1346_v57 = vld [vmem:[%s1463_s13 + $0x1c0] ss:$8 sps:$4 sm:$0xff]   ;;  %v1351_v60 = vld [vmem:[%s1463_s13 + $0xd0] ss:$8 sps:$4 sm:$0xff]  }
  0x2c   : > { %752 = vmatpush1.bf16.msra.mxu1 %v1298_v21  ;;  %712 = vmatprep.subr.bf16.mxu0 %v1299_v22  ;;  %v1352_v61 = vld [vmem:[%s1463_s13 + $0x1d0] ss:$8 sps:$4 sm:$0xff]   ;;  %v1353_v62 = vld [vmem:[%s1463_s13 + $0xe4] ss:$8 sps:$4 sm:$0xff]   ;;  %v1357_v0 = vld [vmem:[%s1463_s13 + $0xe0] ss:$8 sps:$4 sm:$0xff]  }
  0x2d   : > { %753 = vmatprep.subr.bf16.mxu1 %v1301_v23  ;;  %734 = vmatprep.mubr.bf16.mxu0 %v1125_v49  ;;  %v1355_v63 = vld [vmem:[%s1463_s13 + $0x1e4] ss:$8 sps:$4 sm:$0xff]   ;;  %v1358_v1 = vld [vmem:[%s1463_s13 + $0x1e0] ss:$8 sps:$4 sm:$0xff]   ;;  %v1359_v2 = vld [vmem:[%s1463_s13 + $0xf4] ss:$8 sps:$4 sm:$0xff]  }
  0x2e   : > { %775 = vmatprep.mubr.bf16.mxu1 %v1127_v53  ;;  %v1361_v3 = vld [vmem:[%s1463_s13 + $0x1f4] ss:$8 sps:$4 sm:$0xff]   ;;  %v1363_v4 = vld [vmem:[%s1463_s13 + $0xf0] ss:$8 sps:$4 sm:$0xff]   ;;  %v300_v9 = vld [vmem:[#allocation2] sm:$0xff]  ;;  %vm1399_vm0 = vmmov (!%p1192_p6), 0  }
  0x2f   : > { %713 = vmatpush1.bf16.msra.mxu0 %v1303_v24  ;;  %v1364_v5 = vld [vmem:[%s1463_s13 + $0x1f0] ss:$8 sps:$4 sm:$0xff]   ;;  %v301_v13 = vld [vmem:[#allocation2 + $0x8] sm:$0xff]  ;;  %v1369_v22 = vld [vmem:[%s1608_s3 + $0x40] sm:$0xff] (!%p1192_p6)   ;;  %v1398_v24 = vmov (!%p1192_p6), 0.0   ;;  %vm1028_vm1 = vcmask (!%p1192_p6), 523264  }
  0x30   : > { %754 = vmatpush1.bf16.msra.mxu1 %v1304_v25  ;;  %714 = vmatprep.subr.bf16.mxu0 %v1305_v26  ;;  %v1370_v23 = vld [vmem:[%s1608_s3] sm:$0xff] (!%p1192_p6)   ;;  %v1371_v25 = vld [vmem:[%s1608_s3 + $0x48] sm:$0xff] (!%p1192_p6)   ;;  %v1382_v50 = vld [vmem:[%s1608_s3 + $0x30] sm:$0xff] (!%p1192_p6)   ;;  %vm1072_vm2 = vcmask (!%p1192_p6), 7168  }
  0x31   : > { %755 = vmatprep.subr.bf16.mxu1 %v1307_v27  ;;  %v1372_v26 = vld [vmem:[%s1608_s3 + $0x8] sm:$0xff] (!%p1192_p6)   ;;  %v1373_v27 = vld [vmem:[%s1608_s3 + $0x50] sm:$0xff] (!%p1192_p6)  }
  0x33   : > { %715 = vmatpush1.bf16.msra.mxu0 %v1309_v28  ;;  %v796_v28 = vlaneseq (!%p1192_p6) }
  0x34   : > { %756 = vmatpush1.bf16.msra.mxu1 %v1310_v29  ;;  %716 = vmatprep.subr.bf16.mxu0 %v1311_v30  ;;  %v1374_v29 = vld [vmem:[%s1608_s3 + $0x10] sm:$0xff] (!%p1192_p6)   ;;  %v1375_v30 = vld [vmem:[%s1608_s3 + $0x58] sm:$0xff] (!%p1192_p6)  }
  0x35   : > { %757 = vmatprep.subr.bf16.mxu1 %v1313_v31  ;;  %v797_v31 = vshrl.u32 (!%p1192_p6), %v796_v28, 7 }
  0x37   : > { %717 = vmatpush1.bf16.msra.mxu0 %v1315_v32  ;;  %v1376_v32 = vld [vmem:[%s1608_s3 + $0x18] sm:$0xff] (!%p1192_p6)  }
  0x38   : > { %758 = vmatpush1.bf16.msra.mxu1 %v1316_v33  ;;  %718 = vmatprep.subr.bf16.mxu0 %v1317_v34  ;;  %v1377_v33 = vld [vmem:[%s1608_s3 + $0x60] sm:$0xff] (!%p1192_p6)   ;;  %v802_v34 = vsub.s32 (!%p1192_p6), 1, %v797_v31 }
  0x39   : > { %759 = vmatprep.subr.bf16.mxu1 %v1319_v35  ;;  %v798_v35 = vsub.s32 (!%p1192_p6), 0, %v797_v31 }
  0x3b   : > { %719 = vmatpush1.bf16.msra.mxu0 %v1321_v36  ;;  %v1378_v36 = vld [vmem:[%s1608_s3 + $0x20] sm:$0xff] (!%p1192_p6)  }
  0x3c   : > { %760 = vmatpush1.bf16.msra.mxu1 %v1322_v37  ;;  %720 = vmatprep.subr.bf16.mxu0 %v1323_v38  ;;  %v1379_v37 = vld [vmem:[%s1608_s3 + $0x68] sm:$0xff] (!%p1192_p6)  }
  0x3d   : > { %761 = vmatprep.subr.bf16.mxu1 %v1325_v39  ;;  %v794_v39 = vld [vmem:[%s1607_s2] sm:$0x3] (!%p1192_p6) }
  0x3f   : > { %721 = vmatpush1.bf16.msra.mxu0 %v1327_v40  ;;  %v1380_v40 = vld [vmem:[%s1608_s3 + $0x28] sm:$0xff] (!%p1192_p6)  }
  0x40   : > { %762 = vmatpush1.bf16.msra.mxu1 %v1328_v41  ;;  %722 = vmatprep.subr.bf16.mxu0 %v1329_v42  ;;  %v803_v41 = vrot.slane (!%p1192_p6), %v794_v39, %v802_v34 }
  0x41   : > { %763 = vmatprep.subr.bf16.mxu1 %v1331_v43  ;;  %v1385_v43 = vld [vmem:[%s1610_s5] sm:$0xff] (!%p1192_p6)  }
  0x43   : > { %723 = vmatpush1.bf16.msra.mxu0 %v1333_v44  ;;  %v799_v44 = vrot.slane (!%p1192_p6), %v794_v39, %v798_v35 }
  0x44   : > { %764 = vmatpush1.bf16.msra.mxu1 %v1334_v45  ;;  %724 = vmatprep.subr.bf16.mxu0 %v1335_v46  ;;  %v1386_v45 = vld [vmem:[%s1610_s5 + $0x8] sm:$0xff] (!%p1192_p6)  }
  0x45   : > { %765 = vmatprep.subr.bf16.mxu1 %v1337_v47  ;;  %v1381_v47 = vld [vmem:[%s1608_s3 + $0x70] sm:$0xff] (!%p1192_p6)  }
  0x47   : > { %725 = vmatpush1.bf16.msra.mxu0 %v1339_v51 }
  0x48   : > { %766 = vmatpush1.bf16.msra.mxu1 %v1340_v52  ;;  %726 = vmatprep.subr.bf16.mxu0 %v1341_v54  ;;  %v1383_v52 = vld [vmem:[%s1608_s3 + $0x78] sm:$0xff] (!%p1192_p6)  }
  0x49   : > { %767 = vmatprep.subr.bf16.mxu1 %v1343_v55  ;;  %v1384_v54 = vld [vmem:[%s1608_s3 + $0x38] sm:$0xff] (!%p1192_p6)  }
  0x4b   : > { %727 = vmatpush1.bf16.msra.mxu0 %v1345_v56  ;;  %v1387_v56 = vld [vmem:[%s1610_s5 + $0x10] sm:$0xff] (!%p1192_p6)  }
  0x4c   : > { %768 = vmatpush1.bf16.msra.mxu1 %v1346_v57  ;;  %728 = vmatprep.subr.bf16.mxu0 %v1347_v58  ;;  %v1388_v57 = vld [vmem:[%s1610_s5 + $0x18] sm:$0xff] (!%p1192_p6)  }
  0x4d   : > { %769 = vmatprep.subr.bf16.mxu1 %v1349_v59  ;;  %v1193_v59 = vld [vmem:[%s1609_s4] ss:$0 sm:$0xff] (!%p1192_p6) }
  0x4f   : > { %729 = vmatpush1.bf16.msra.mxu0 %v1351_v60 }
  0x50   : > { %770 = vmatpush1.bf16.msra.mxu1 %v1352_v61  ;;  %730 = vmatprep.subr.bf16.mxu0 %v1353_v62 }
  0x51   : > { %771 = vmatprep.subr.bf16.mxu1 %v1355_v63 }
  0x53   : > { %731 = vmatpush1.bf16.msra.mxu0 %v1357_v0 }
  0x54   : > { %772 = vmatpush1.bf16.msra.mxu1 %v1358_v1  ;;  %732 = vmatprep.subr.bf16.mxu0 %v1359_v2 }
  0x55   : > { %773 = vmatprep.subr.bf16.mxu1 %v1361_v3  ;;  %v1210_v3 = vld [vmem:[#allocation3] ss:$0 sm:$0xff] (!%p1192_p6) }
  0x57   : > { %733 = vmatpush1.bf16.msra.mxu0 %v1363_v4 }
  0x58   : > { %774 = vmatpush1.bf16.msra.mxu1 %v1364_v5  ;;  %1219 = vmatprep.subr.bf16.mxu0 (!%p1192_p6), %v1369_v22 }
  0x59   : > { %1246 = vmatprep.subr.bf16.mxu1 (!%p1192_p6), %v1398_v24 }
  0x5a   : > { %735 = vmatmul.mubr.bf16.vlgmr.msra.gmra.mrb[0].mxu0 %v1124_v6 }
  0x5b   : > { %776 = vmatmul.mubr.bf16.vlgmr.msra.gmra.mrb[0].mxu1 %v1126_v7  ;;  %1220 = vmatpush3.bf16.msra.mxu0 (!%p1192_p6), %v1370_v23 }
  0x5c   : > { %1221 = vmatprep.subr.bf16.mxu0 (!%p1192_p6), %v1371_v25  ;;  %1247 = vmatpush3.bf16.msra.mxu1 (!%p1192_p6), %v1385_v43 }
  0x5d   : > { %1248 = vmatprep.subr.bf16.mxu1 (!%p1192_p6), %v1398_v24  ;;  %1254 = vmatprep.mubr.msk.bf16.mxu1 (!%p1192_p6), %vm1399_vm0, %v1398_v24 }
  0x5f   : > { %1222 = vmatpush3.bf16.msra.mxu0 (!%p1192_p6), %v1372_v26 }
  0x60   : > { %1223 = vmatprep.subr.bf16.mxu0 (!%p1192_p6), %v1373_v27  ;;  %1249 = vmatpush3.bf16.msra.mxu1 (!%p1192_p6), %v1386_v45 }
  0x61   : > { %1250 = vmatprep.subr.bf16.mxu1 (!%p1192_p6), %v1398_v24 }
  0x63   : > { %1224 = vmatpush3.bf16.msra.mxu0 (!%p1192_p6), %v1374_v29 }
  0x64   : > { %1225 = vmatprep.subr.bf16.mxu0 (!%p1192_p6), %v1375_v30  ;;  %1251 = vmatpush3.bf16.msra.mxu1 (!%p1192_p6), %v1387_v56 }
  0x65   : > { %1252 = vmatprep.subr.bf16.mxu1 (!%p1192_p6), %v1398_v24 }
  0x67   : > { %1226 = vmatpush3.bf16.msra.mxu0 (!%p1192_p6), %v1376_v32 }
  0x68   : > { %1227 = vmatprep.subr.bf16.mxu0 (!%p1192_p6), %v1377_v33  ;;  %1253 = vmatpush3.bf16.msra.mxu1 (!%p1192_p6), %v1388_v57 }
  0x6b   : > { %1228 = vmatpush3.bf16.msra.mxu0 (!%p1192_p6), %v1378_v36 }
  0x6c   : > { %1229 = vmatprep.subr.bf16.mxu0 (!%p1192_p6), %v1379_v37 }
  0x6f   : > { %1230 = vmatpush3.bf16.msra.mxu0 (!%p1192_p6), %v1380_v40 }
  0x70   : > { %1231 = vmatprep.subr.bf16.mxu0 (!%p1192_p6), %v1381_v47 }
  0x73   : > { %1232 = vmatpush3.bf16.msra.mxu0 (!%p1192_p6), %v1382_v50 }
  0x74   : > { %1233 = vmatprep.subr.bf16.mxu0 (!%p1192_p6), %v1383_v52 }
  0x77   : > { %1234 = vmatpush3.bf16.msra.mxu0 (!%p1192_p6), %v1384_v54 }
 0x12d   : > { %v736_v8 = vpop.f32.mrb[0].mxu0 }
 0x12e   : > { %v777_v10 = vpop.f32.mrb[0].mxu1  ;;  %v738_v12 = vpop.f32.mrb[1].mxu0  ;;  %791 = sbr.rel (%p1192_p6) target bundleno = 759 (0x2f7), region = 56 }
 0x12f   : > { %v778_v11 = vadd.f32 %v777_v10, %v736_v8  ;;  %v779_v14 = vpop.f32.mrb[1].mxu1  ;;  %v740_v16 = vpop.f32.mrb[2].mxu0 }
 0x130   : > { %v780_v15 = vadd.f32 %v779_v14, %v738_v12  ;;  %v781_v17 = vpop.f32.mrb[2].mxu1  ;;  %v741_v19 = vpop.f32.mrb[3].mxu0 }
 0x131   : > { %v784_v18 = vadd.f32 %v778_v11, %v300_v9  ;;  %v782_v20 = vpop.f32.mrb[3].mxu1 }
 0x132   : > { %v785_v21 = vadd.f32 %v780_v15, %v301_v13 }
 0x133   : > { %786 = vst [vmem:[#allocation2] sm:$0xff] %v784_v18 }
 0x134   : > { %787 = vst [vmem:[#allocation2 + $0x8] sm:$0xff] %v785_v21 }
 0x13a   : > { %v792_v42 = vld [vmem:[#allocation2] sm:$0xff] }
 0x13b   : > { %v793_v38 = vld [vmem:[#allocation2 + $0x8] sm:$0xff]  ;;  %v806_v49 = vadd.f32 %v799_v44, %v792_v42 }
 0x13c   : > { %v807_v46 = vadd.f32 %v803_v41, %v793_v38 }
 0x13d   : > { %v808_v53 = vmax.f32 %v806_v49, 0.0 }
 0x13e   : > { %v809_v48 = vmax.f32 %v807_v46, 0.0 }
 0x13f   : > { %v810_v55 = vpack.c.bf16 %v808_v53, %v808_v53 }
 0x140   : > { %v811_v51 = vpack.c.bf16 %v809_v48, %v809_v48 }
 0x142   : > { %979 = vmatprep.mubr.bf16.mxu0 %v811_v51 }
 0x143   : > { %980 = vmatmul.mubr.bf16.vlgmr.msra.gmra.mrb[0].mxu0 %v810_v55 }
 0x216   : > { %v1235_v58 = vpop.f32.mrb[0].mxu0 }
 0x217   : > { %v1236_v60 = vpop.f32.mrb[1].mxu0 }
 0x218   : > { %v1237_v61 = vadd.f32 %v1236_v60, %v1235_v58  ;;  %v1238_v62 = vpop.f32.mrb[2].mxu0 }
 0x219   : > { %v1239_v63 = vpop.f32.mrb[3].mxu0 }
 0x21a   : > { %v982_v0 = vadd.f32 %v1237_v61, %v1193_v59 }
 0x21c   : > { %v987_v1 = vmax.f32 %v982_v0, 0.0 }
 0x21e   : > { %v988_v2 = vpack.c.bf16 %v987_v1, %v987_v1 }
 0x220   : > { %1255 = vmatmul.mubr.msk.bf16.vlgmr.msra.gmra.mrb[0].mxu1 %vm1028_vm1, %v988_v2 }
 0x2f3   : > { %v1066_v4 = vpop.f32.mrb[0].mxu1 }
 0x2f4   : > { %v1067_v5 = vadd.f32 %v1210_v3, %v1066_v4  ;;  %v1256_v6 = vpop.f32.mrb[1].mxu1 }
 0x2f5   : > { %v1069_v7 = vpop.f32.mrb[2].mxu1 }
 0x2f6   : > { %1073 = vst.msk [vmem:[%s1612_s7] sm:$0xff] %vm1072_vm2, %v1067_v5  ;;  %v1257_v8 = vpop.f32.mrb[3].mxu1 }
 0x2f7 PF: > { %s19_s26 = sadd.s32 1, %s1395_s26  }
 0x2f8   : > { %p16_p7 = scmp.ge.s32.totalorder %s19_s26, 5  }
 0x2fa   :  { %18 = sbr.rel (!%p16_p7) target bundleno = 3 (0x3), region = 85 }

</bundles_post_ra>
